<compile_context>
chip_gen: v5e
topology: v5e:2x2
jax: 0.10.0
libtpu: 0.0.40
codegen_flags: <defaults>
</compile_context>

<pallas_src>
import jax
import jax.numpy as jnp
from jax.experimental import pallas as pl
from jax.experimental.pallas import tpu as pltpu


def _corr_kernel(e_rows_ref, e_full_ref, dist_ref, mask_ref,
                 corr_ref, valid_ref):
    f32 = jnp.float32
    # Cast AFTER the (possibly narrow-dtype) load.
    e_rows = e_rows_ref[...].astype(f32)   # (TM, H) row slab of embeddings
    e_full = e_full_ref[...].astype(f32)   # (B,  H) full embeddings (resident)
    d = dist_ref[...].astype(f32)          # (TM, B) raw distances (NOT negated)
    m = mask_ref[...].astype(f32)          # (TM, B) same-path mask

    # ---- fused F.normalize(p=2, dim=1, eps=1e-12) -----------------------------
    nr = jnp.maximum(jnp.sqrt(jnp.sum(e_rows * e_rows, axis=1, keepdims=True)), 1e-12)
    nf = jnp.maximum(jnp.sqrt(jnp.sum(e_full * e_full, axis=1, keepdims=True)), 1e-12)
    en_rows = e_rows * (1.0 / nr)
    en_full = e_full * (1.0 / nf)

    # ---- cosine-sim slab on the MXU: (TM, B) = en_rows @ en_full^T ------------
    s = jax.lax.dot_general(
        en_rows, en_full, (((1,), (1,)), ((), ())),
        preferred_element_type=f32,
        precision=jax.lax.Precision.HIGHEST)

    # ---- single-pass masked moments; row sums via MXU (ones column) -----------
    ones_col = jnp.ones((m.shape[1], 1), f32)

    def rowsum(x):  # (TM, B) -> (TM, 1) contraction on the MXU
        return jax.lax.dot_general(
            x, ones_col, (((1,), (0,)), ((), ())),
            preferred_element_type=f32,
            precision=jax.lax.Precision.HIGHEST)

    sm = s * m
    dm = d * m
    n = rowsum(m)            # (TM, 1) mask counts
    s_sum = rowsum(sm)
    d_sum = rowsum(dm)
    ss_sum = rowsum(sm * s)
    dd_sum = rowsum(dm * d)
    sd_sum = rowsum(sm * d)

    inv_n = 1.0 / jnp.maximum(n, 1.0)                # guard empty/singleton rows
    es = s_sum * inv_n
    ed = d_sum * inv_n
    cov = sd_sum * inv_n - es * ed
    var_s = jnp.maximum(ss_sum * inv_n - es * es, 0.0)   # clamp: avoid sqrt(-eps)
    var_d = jnp.maximum(dd_sum * inv_n - ed * ed, 0.0)

    # torch correlates against -distances; corr(s, -d) = -corr(s, d).
    corrs = -cov / (jnp.sqrt(var_s) * jnp.sqrt(var_d) + 1e-8)   # (TM, 1)

    valid = (n >= 2.0).astype(f32)                              # (TM, 1)
    corr_ref[...] = corrs * valid
    valid_ref[...] = valid


def correlation_loss(embs, distances, id_mask, *, neg_coor=False, row_block=None):
    """JAX/Pallas equivalent of CorrelationLoss.forward."""
    # torch's .squeeze(-1): drop a trailing size-1 dim if present.
    if embs.ndim == 3 and embs.shape[-1] == 1:
        embs = embs[..., 0]

    b, h = embs.shape
    if b == 0:
        return jnp.float32(0.0)

    # Row-block size: single block for small B, else 256-row slabs
    # (fits v7x's 64 MiB VMEM with double-buffered (TM,B) inputs at B~4k).
    if row_block is None:
        tm = b if b <= 512 else 256
    else:
        tm = min(row_block, b)
    if tm != b:
        tm = max(8, (tm // 8) * 8)   # keep blocks (8,128)-legal
    grid = (pl.cdiv(b, tm),)

    corr_w, valid = pl.pallas_call(
        _corr_kernel,
        out_shape=(jax.ShapeDtypeStruct((b, 1), jnp.float32),
                   jax.ShapeDtypeStruct((b, 1), jnp.float32)),
        grid=grid,
        in_specs=[
            pl.BlockSpec((tm, h), lambda i: (i, 0)),   # embs row slab
            pl.BlockSpec((b, h), lambda i: (0, 0)),    # full embs (resident)
            pl.BlockSpec((tm, b), lambda i: (i, 0)),   # distances row slab
            pl.BlockSpec((tm, b), lambda i: (i, 0)),   # id_mask row slab (native dtype)
        ],
        out_specs=(pl.BlockSpec((tm, 1), lambda i: (i, 0)),
                   pl.BlockSpec((tm, 1), lambda i: (i, 0))),
        compiler_params=pltpu.CompilerParams(
            dimension_semantics=("parallel",),
            vmem_limit_bytes=64 << 20),
    )(embs, embs, distances, id_mask)

    # Tiny epilogue on (B,1) arrays: mean over valid rows, "no valid -> 0.0".
    n_valid = jnp.sum(valid)
    avg = jnp.where(n_valid > 0.0,
                    jnp.sum(corr_w) / jnp.maximum(n_valid, 1.0),
                    jnp.float32(0.0))
    return (1.0 - avg) if neg_coor else avg


def _reference(embs, distances, id_mask, *, neg_coor=False):
    """Pure-JAX reference mirroring the PyTorch forward (for validation)."""
    embs = jnp.asarray(embs, jnp.float32)
    if embs.ndim == 3 and embs.shape[-1] == 1:
        embs = embs[..., 0]
    distances = jnp.asarray(distances, jnp.float32)
    id_mask = jnp.asarray(id_mask, jnp.float32)

    norm = jnp.linalg.norm(embs, axis=1, keepdims=True)
    norm_embs = embs / jnp.maximum(norm, 1e-12)
    sim_matrix = jnp.einsum('ih,jh->ij', norm_embs, norm_embs,
                            precision=jax.lax.Precision.HIGHEST)

    valid = id_mask.sum(axis=1) >= 2
    if not bool(valid.any()):
        return jnp.float32(0.0)

    sim_v = sim_matrix[valid]
    dist_v = -distances[valid]
    mask_v = id_mask[valid]

    msum = mask_v.sum(axis=1, keepdims=True)
    sim_means = (sim_v * mask_v).sum(axis=1, keepdims=True) / msum
    dist_means = (dist_v * mask_v).sum(axis=1, keepdims=True) / msum
    sim_c = sim_v - sim_means
    dist_c = dist_v - dist_means
    cov = (sim_c * dist_c * mask_v).sum(axis=1) / msum[:, 0]
    sim_std = jnp.sqrt((sim_c ** 2 * mask_v).sum(axis=1) / msum[:, 0])
    dist_std = jnp.sqrt((dist_c ** 2 * mask_v).sum(axis=1) / msum[:, 0])
    corrs = cov / (sim_std * dist_std + 1e-8)
    avg = corrs.mean()
    return (1.0 - avg) if neg_coor else avg


if __name__ == "__main__":
    key = jax.random.PRNGKey(0)
    k1, k2, k3 = jax.random.split(key, 3)

    batch, hidden = 32, 32
    # embs carries a trailing size-1 dim to exercise the squeeze(-1) path.
    embs = jax.random.normal(k1, (batch, hidden, 1), dtype=jnp.float32)

    # Group ("same path") structure for id_mask; force row 0 to be a singleton
    # so at least one row is invalid (mask row-sum < 2).  Kept as int8 so the
    # kernel DMAs the narrow native dtype (no f32 upcast in the wrapper).
    groups = jax.random.randint(k2, (batch,), 0, 6)
    groups = groups.at[0].set(97)
    id_mask = (groups[:, None] == groups[None, :]).astype(jnp.int8)

    base = jax.random.uniform(k3, (batch, batch), dtype=jnp.float32,
                              minval=0.0, maxval=10.0)
    distances = 0.5 * (base + base.T)

    for neg_coor in (False, True):
        got = jax.block_until_ready(
            correlation_loss(embs, distances, id_mask, neg_coor=neg_coor))
        ref = _reference(embs, distances, id_mask, neg_coor=neg_coor)
        assert jnp.allclose(got, ref, atol=1e-5, rtol=1e-5), (neg_coor, got, ref)

    print("KERNEL_OK")
</pallas_src>

<mosaic_0001>
module attributes {stable_mosaic.version = 11 : i64} {
  func.func @_corr_kernel(%arg0: i32, %arg1: memref<32x32xf32, #tpu.memory_space<vmem>>, %arg2: memref<32x32xf32, #tpu.memory_space<vmem>>, %arg3: memref<32x32xf32, #tpu.memory_space<vmem>>, %arg4: memref<32x32xi8, #tpu.memory_space<vmem>>, %arg5: memref<32x1xf32, #tpu.memory_space<vmem>>, %arg6: memref<32x1xf32, #tpu.memory_space<vmem>>) attributes {dimension_semantics = [#tpu.dimension_semantics<parallel>], iteration_bounds = array<i64: 1>, scalar_prefetch = 0 : i64, scratch_operands = 0 : i64, tpu.core_type = #tpu.core_type<tc>, window_params = [{transform_indices = @transform_0, window_bounds = array<i64: 32, 32>}, {pipeline_mode = #tpu.pipeline_mode<synchronous>, transform_indices = @transform_1, window_bounds = array<i64: 32, 32>}, {transform_indices = @transform_2, window_bounds = array<i64: 32, 32>}, {transform_indices = @transform_3, window_bounds = array<i64: 32, 32>}, {transform_indices = @transform_4, window_bounds = array<i64: 32, 1>}, {transform_indices = @transform_5, window_bounds = array<i64: 32, 1>}]} {
    %c0 = arith.constant 0 : index
    %c0_0 = arith.constant 0 : index
    %0 = vector.load %arg1[%c0, %c0_0] : memref<32x32xf32, #tpu.memory_space<vmem>>, vector<32x32xf32>
    %c0_1 = arith.constant 0 : index
    %c0_2 = arith.constant 0 : index
    %1 = vector.load %arg2[%c0_1, %c0_2] : memref<32x32xf32, #tpu.memory_space<vmem>>, vector<32x32xf32>
    %c0_3 = arith.constant 0 : index
    %c0_4 = arith.constant 0 : index
    %2 = vector.load %arg3[%c0_3, %c0_4] : memref<32x32xf32, #tpu.memory_space<vmem>>, vector<32x32xf32>
    %c0_5 = arith.constant 0 : index
    %c0_6 = arith.constant 0 : index
    %3 = vector.load %arg4[%c0_5, %c0_6] : memref<32x32xi8, #tpu.memory_space<vmem>>, vector<32x32xi8>
    %4 = arith.sitofp %3 : vector<32x32xi8> to vector<32x32xf32>
    %5 = arith.mulf %0, %0 : vector<32x32xf32>
    %cst = arith.constant dense<0.000000e+00> : vector<32xf32>
    %6 = vector.multi_reduction <add>, %5, %cst [1] : vector<32x32xf32> to vector<32xf32>
    %7 = vector.shape_cast %6 : vector<32xf32> to vector<32x1xf32>
    %8 = math.sqrt %7 : vector<32x1xf32>
    %cst_7 = arith.constant 9.99999996E-13 : f32
    %9 = vector.broadcast %cst_7 : f32 to vector<32x1xf32>
    %10 = arith.maximumf %8, %9 : vector<32x1xf32>
    %11 = arith.mulf %1, %1 : vector<32x32xf32>
    %cst_8 = arith.constant dense<0.000000e+00> : vector<32xf32>
    %12 = vector.multi_reduction <add>, %11, %cst_8 [1] : vector<32x32xf32> to vector<32xf32>
    %13 = vector.shape_cast %12 : vector<32xf32> to vector<32x1xf32>
    %14 = math.sqrt %13 : vector<32x1xf32>
    %cst_9 = arith.constant 9.99999996E-13 : f32
    %15 = vector.broadcast %cst_9 : f32 to vector<32x1xf32>
    %16 = arith.maximumf %14, %15 : vector<32x1xf32>
    %cst_10 = arith.constant 1.000000e+00 : f32
    %17 = vector.broadcast %cst_10 : f32 to vector<32x1xf32>
    %18 = arith.divf %17, %10 : vector<32x1xf32>
    %19 = vector.broadcast %18 : vector<32x1xf32> to vector<32x32xf32>
    %20 = arith.mulf %0, %19 : vector<32x32xf32>
    %cst_11 = arith.constant 1.000000e+00 : f32
    %21 = vector.broadcast %cst_11 : f32 to vector<32x1xf32>
    %22 = arith.divf %21, %16 : vector<32x1xf32>
    %23 = vector.broadcast %22 : vector<32x1xf32> to vector<32x32xf32>
    %24 = arith.mulf %1, %23 : vector<32x32xf32>
    %cst_12 = arith.constant dense<0.000000e+00> : vector<32x32xf32>
    %25 = tpu.matmul %20, %24, %cst_12 {dimension_numbers = #tpu.dot_dimension_numbers<[1], [1], [0], [0], [0, 0, 1, 0], [], []>, precision = #tpu.contract_precision<fp32>} : vector<32x32xf32>, vector<32x32xf32>, vector<32x32xf32> -> vector<32x32xf32>
    %cst_13 = arith.constant 1.000000e+00 : f32
    %26 = vector.broadcast %cst_13 : f32 to vector<32x1xf32>
    %27 = arith.mulf %25, %4 : vector<32x32xf32>
    %28 = arith.mulf %2, %4 : vector<32x32xf32>
    %cst_14 = arith.constant dense<0.000000e+00> : vector<32x1xf32>
    %29 = tpu.matmul %4, %26, %cst_14 {dimension_numbers = #tpu.dot_dimension_numbers<[1], [0], [0], [1], [0, 0, 1, 1], [], []>, precision = #tpu.contract_precision<fp32>} : vector<32x32xf32>, vector<32x1xf32>, vector<32x1xf32> -> vector<32x1xf32>
    %cst_15 = arith.constant dense<0.000000e+00> : vector<32x1xf32>
    %30 = tpu.matmul %27, %26, %cst_15 {dimension_numbers = #tpu.dot_dimension_numbers<[1], [0], [0], [1], [0, 0, 1, 1], [], []>, precision = #tpu.contract_precision<fp32>} : vector<32x32xf32>, vector<32x1xf32>, vector<32x1xf32> -> vector<32x1xf32>
    %cst_16 = arith.constant dense<0.000000e+00> : vector<32x1xf32>
    %31 = tpu.matmul %28, %26, %cst_16 {dimension_numbers = #tpu.dot_dimension_numbers<[1], [0], [0], [1], [0, 0, 1, 1], [], []>, precision = #tpu.contract_precision<fp32>} : vector<32x32xf32>, vector<32x1xf32>, vector<32x1xf32> -> vector<32x1xf32>
    %32 = arith.mulf %27, %25 : vector<32x32xf32>
    %cst_17 = arith.constant dense<0.000000e+00> : vector<32x1xf32>
    %33 = tpu.matmul %32, %26, %cst_17 {dimension_numbers = #tpu.dot_dimension_numbers<[1], [0], [0], [1], [0, 0, 1, 1], [], []>, precision = #tpu.contract_precision<fp32>} : vector<32x32xf32>, vector<32x1xf32>, vector<32x1xf32> -> vector<32x1xf32>
    %34 = arith.mulf %28, %2 : vector<32x32xf32>
    %cst_18 = arith.constant dense<0.000000e+00> : vector<32x1xf32>
    %35 = tpu.matmul %34, %26, %cst_18 {dimension_numbers = #tpu.dot_dimension_numbers<[1], [0], [0], [1], [0, 0, 1, 1], [], []>, precision = #tpu.contract_precision<fp32>} : vector<32x32xf32>, vector<32x1xf32>, vector<32x1xf32> -> vector<32x1xf32>
    %36 = arith.mulf %27, %2 : vector<32x32xf32>
    %cst_19 = arith.constant dense<0.000000e+00> : vector<32x1xf32>
    %37 = tpu.matmul %36, %26, %cst_19 {dimension_numbers = #tpu.dot_dimension_numbers<[1], [0], [0], [1], [0, 0, 1, 1], [], []>, precision = #tpu.contract_precision<fp32>} : vector<32x32xf32>, vector<32x1xf32>, vector<32x1xf32> -> vector<32x1xf32>
    %cst_20 = arith.constant 1.000000e+00 : f32
    %38 = vector.broadcast %cst_20 : f32 to vector<32x1xf32>
    %39 = arith.maximumf %29, %38 : vector<32x1xf32>
    %cst_21 = arith.constant 1.000000e+00 : f32
    %40 = vector.broadcast %cst_21 : f32 to vector<32x1xf32>
    %41 = arith.divf %40, %39 : vector<32x1xf32>
    %42 = arith.mulf %30, %41 : vector<32x1xf32>
    %43 = arith.mulf %31, %41 : vector<32x1xf32>
    %44 = arith.mulf %37, %41 : vector<32x1xf32>
    %45 = arith.mulf %42, %43 : vector<32x1xf32>
    %46 = arith.subf %44, %45 : vector<32x1xf32>
    %47 = arith.mulf %33, %41 : vector<32x1xf32>
    %48 = arith.mulf %42, %42 : vector<32x1xf32>
    %49 = arith.subf %47, %48 : vector<32x1xf32>
    %cst_22 = arith.constant 0.000000e+00 : f32
    %50 = vector.broadcast %cst_22 : f32 to vector<32x1xf32>
    %51 = arith.maximumf %49, %50 : vector<32x1xf32>
    %52 = arith.mulf %35, %41 : vector<32x1xf32>
    %53 = arith.mulf %43, %43 : vector<32x1xf32>
    %54 = arith.subf %52, %53 : vector<32x1xf32>
    %cst_23 = arith.constant 0.000000e+00 : f32
    %55 = vector.broadcast %cst_23 : f32 to vector<32x1xf32>
    %56 = arith.maximumf %54, %55 : vector<32x1xf32>
    %cst_24 = arith.constant 0.000000e+00 : f32
    %57 = vector.broadcast %cst_24 : f32 to vector<32x1xf32>
    %58 = arith.subf %57, %46 : vector<32x1xf32>
    %59 = math.sqrt %51 : vector<32x1xf32>
    %60 = math.sqrt %56 : vector<32x1xf32>
    %61 = arith.mulf %59, %60 : vector<32x1xf32>
    %cst_25 = arith.constant 9.99999993E-9 : f32
    %62 = vector.broadcast %cst_25 : f32 to vector<32x1xf32>
    %63 = arith.addf %61, %62 : vector<32x1xf32>
    %64 = arith.divf %58, %63 : vector<32x1xf32>
    %cst_26 = arith.constant 2.000000e+00 : f32
    %65 = vector.broadcast %cst_26 : f32 to vector<32x1xf32>
    %66 = arith.cmpf oge, %29, %65 : vector<32x1xf32>
    %67 = arith.extui %66 : vector<32x1xi1> to vector<32x1xi32>
    %68 = arith.sitofp %67 : vector<32x1xi32> to vector<32x1xf32>
    %69 = arith.mulf %64, %68 : vector<32x1xf32>
    %c0_27 = arith.constant 0 : index
    %c0_28 = arith.constant 0 : index
    %70 = vector.load %arg5[%c0_27, %c0_28] : memref<32x1xf32, #tpu.memory_space<vmem>>, vector<32x1xf32>
    tpu.vector_store %arg5[%c0_27, %c0_28], %69 {strides = array<i32>} : memref<32x1xf32, #tpu.memory_space<vmem>>, vector<32x1xf32>,
    %c0_29 = arith.constant 0 : index
    %c0_30 = arith.constant 0 : index
    %71 = vector.load %arg6[%c0_29, %c0_30] : memref<32x1xf32, #tpu.memory_space<vmem>>, vector<32x1xf32>
    tpu.vector_store %arg6[%c0_29, %c0_30], %68 {strides = array<i32>} : memref<32x1xf32, #tpu.memory_space<vmem>>, vector<32x1xf32>,
    return
  }
  func.func @transform_0(%arg0: i32) -> (i32, i32) {
    %c0_i32 = arith.constant 0 : i32
    %c0_i32_0 = arith.constant 0 : i32
    return %arg0, %c0_i32 : i32, i32
  }
  func.func @transform_1(%arg0: i32) -> (i32, i32) {
    %c0_i32 = arith.constant 0 : i32
    %c0_i32_0 = arith.constant 0 : i32
    %c0_i32_1 = arith.constant 0 : i32
    return %c0_i32, %c0_i32_0 : i32, i32
  }
  func.func @transform_2(%arg0: i32) -> (i32, i32) {
    %c0_i32 = arith.constant 0 : i32
    %c0_i32_0 = arith.constant 0 : i32
    return %arg0, %c0_i32 : i32, i32
  }
  func.func @transform_3(%arg0: i32) -> (i32, i32) {
    %c0_i32 = arith.constant 0 : i32
    %c0_i32_0 = arith.constant 0 : i32
    return %arg0, %c0_i32 : i32, i32
  }
  func.func @transform_4(%arg0: i32) -> (i32, i32) {
    %c0_i32 = arith.constant 0 : i32
    %c0_i32_0 = arith.constant 0 : i32
    return %arg0, %c0_i32 : i32, i32
  }
  func.func @transform_5(%arg0: i32) -> (i32, i32) {
    %c0_i32 = arith.constant 0 : i32
    %c0_i32_0 = arith.constant 0 : i32
    return %arg0, %c0_i32 : i32, i32
  }
}

</mosaic_0001>

<bundles_post_ra>
// kernel: tpu_custom_call.1
= control target key start
LH: loop header
LB: loop body
LE: loop exit
PB: predicated region body
PF: predicated region fallthrough
CT: control target
= control target key end

     0   :  { %11 = vsyncpa [#allocation3], 0  ;;  %s3838_s0 = inlined_call_operand.hbm [shape: f32[32,32], index: 0, kind: input, shape index: {}]   ;;  %s3839_s1 = inlined_call_operand.hbm [shape: f32[32,32], index: 1, kind: input, shape index: {}]   ;;  %s3840_s2 = inlined_call_operand.hbm [shape: f32[32,32], index: 2, kind: input, shape index: {}]   ;;  %s3841_s3 = inlined_call_operand.hbm [shape: s8[32,32], index: 3, kind: input, shape index: {}]   ;;  %s3842_s4 = inlined_call_operand.vmem [shape: f32[32,1], index: 4, kind: output, shape index: {0}]   ;;  %s3843_s5 = inlined_call_operand.vmem [shape: f32[32,1], index: 5, kind: output, shape index: {1}]  }
   0x1   :  { %12 = vsyncpa [#allocation5], 0 }
   0x2   :  { %13 = vsyncpa [#allocation8], 0  ;;  %s31_s20 = sshll.u32 %s3839_s1, 4  ;;  %s2622_s21 = smov [#allocation4]   ;;  %s32_s20 = int_to_ptr.hbm [resolvable:$true] %s31_s20 }
   0x3   :  { %s33_s22 = sshll.u32 %s2622_s21, 4  ;;  %s18_s25 = sshll.u32 %s3838_s0, 4  ;;  %s34_s22 = int_to_ptr.vmem [resolvable:$true] %s33_s22  ;;  %s19_s25 = int_to_ptr.hbm [resolvable:$true] %s18_s25 }
   0x4   :  { %s2623_s26 = smov 128   ;;  %s2624_s27 = smov 8  }
   0x5   :  { %39 = dma.hbm_to_vmem [thread:$0]  %s32_s20, 512, %s34_s22, [#allocation5], %s2623_s26, %s2623_s26, %s2624_s27  }
   0x6   :  { %s2625_s28 = smov [#allocation2]   ;;  %s44_s7 = sshll.u32 %s3840_s2, 4  ;;  %s45_s7 = int_to_ptr.hbm [resolvable:$true] %s44_s7 }
   0x7   :  { %s20_s29 = sshll.u32 %s2625_s28, 4  ;;  %s58_s9 = sshll.u32 %s3841_s3, 4  ;;  %s21_s29 = int_to_ptr.vmem [resolvable:$true] %s20_s29  ;;  %s59_s9 = int_to_ptr.hbm [resolvable:$true] %s58_s9 }
   0x8   :  { %26 = dma.hbm_to_vmem [thread:$0]  %s19_s25, 512, %s21_s29, [#allocation3], %s2623_s26, %s2623_s26, %s2624_s27  }
   0x9   :  { %s2626_s10 = smov [#allocation6]   ;;  %s2627_s0 = smov [#allocation7]  }
   0xa   :  { %s46_s11 = sshll.u32 %s2626_s10, 4  ;;  %s60_s12 = sshll.u32 %s2627_s0, 4  ;;  %s47_s11 = int_to_ptr.vmem [resolvable:$true] %s46_s11  ;;  %s61_s12 = int_to_ptr.vmem [resolvable:$true] %s60_s12 }
   0xb   :  { %52 = dma.hbm_to_vmem [thread:$0]  %s45_s7, 512, %s47_s11, [#allocation5], %s2623_s26, %s2623_s26, %s2624_s27  }
   0xc   :  { %63 = dma.hbm_to_vmem [thread:$0]  %s59_s9, 128, %s61_s12, [#allocation8]  }
   0xd   :  { %2616 = dma.done.wait [#allocation3], 512  }
   0xe   :  { %2617 = vsyncadd [#allocation3], 4294966784 }
   0xf   :  { %2618 = dma.done.wait [#allocation5], 1024  }
  0x10   :  { %2619 = vsyncadd [#allocation5], 4294966272 }
  0x11   :  { %2620 = dma.done.wait [#allocation8], 128  }
  0x12   :  { %2621 = vsyncadd [#allocation8], 4294967168  ;;  %v2672_v0 = vld [vmem:[#allocation4 + $0x18] sm:$0xff]  ;;  %vm105_vm0 = vcmask 261120   ;;  %v2674_v1 = vld [vmem:[#allocation4 + $0x8] sm:$0xff] }
  0x13   :  { %v2676_v2 = vld [vmem:[#allocation2 + $0x10] sm:$0xff]  ;;  %v173_v3 = vmul.f32 %v2672_v0, %v2672_v0  ;;  %v171_v4 = vmul.f32 %v2674_v1, %v2674_v1  ;;  %v2686_v7 = vld [vmem:[#allocation4] sm:$0xff]  ;;  %v2691_v11 = vld [vmem:[#allocation2 + $0x18] sm:$0xff] }
  0x14   :  { %v103_v5 = vmul.f32 %v2676_v2, %v2676_v2  ;;  %v2684_v6 = vld [vmem:[#allocation4 + $0x10] sm:$0xff]  ;;  %v170_v13 = vmul.f32 %v2686_v7, %v2686_v7  ;;  %v104_v14 = vmul.f32 %v2691_v11, %v2691_v11  ;;  %v2702_v18 = vld [vmem:[#allocation2 + $0x8] sm:$0xff]  ;;  %v2704_v19 = vld [vmem:[#allocation2] sm:$0xff] }
  0x15   :  { %v183_v8 = vsel %vm105_vm0, %v173_v3, 0.0  ;;  %v177_v9 = vsel %vm105_vm0, %v171_v4, 0.0  ;;  %v172_v12 = vmul.f32 %v2684_v6, %v2684_v6  ;;  %v102_v20 = vmul.f32 %v2702_v18, %v2702_v18 }
  0x16   :  { %v112_v10 = vsel %vm105_vm0, %v103_v5, 0.0  ;;  %184 = vadd.xlane.f32.xlu0 %v183_v8  ;;  %178 = vadd.xlane.f32.xlu1 %v177_v9  ;;  %v174_v16 = vsel %vm105_vm0, %v170_v13, 0.0  ;;  %v115_v17 = vsel %vm105_vm0, %v104_v14, 0.0  ;;  %v101_v21 = vmul.f32 %v2704_v19, %v2704_v19 }
  0x17   :  { %113 = vadd.xlane.f32.xlu2 %v112_v10  ;;  %v180_v15 = vsel %vm105_vm0, %v172_v12, 0.0  ;;  %v109_v22 = vsel %vm105_vm0, %v102_v20, 0.0 }
  0x18   :  { %v106_v23 = vsel %vm105_vm0, %v101_v21, 0.0 }
  0x1e   :  { %181 = vadd.xlane.f32.xlu0 %v180_v15  ;;  %175 = vadd.xlane.f32.xlu1 %v174_v16 }
  0x1f   :  { %116 = vadd.xlane.f32.xlu2 %v115_v17 }
  0x26   :  { %110 = vadd.xlane.f32.xlu1 %v109_v22  ;;  %107 = vadd.xlane.f32.xlu0 %v106_v23 }
  0x89   :  { %v2712_v24 = vpop.xlane.xlu0 %184  ;;  %v2714_v25 = vpop.xlane.xlu1 %178 }
  0x8a   :  { %2456 = vrsqrt.f32 %v2712_v24  ;;  %v2717_v26 = vpop.xlane.xlu2 %113  ;;  %vm229_vm1 = vcmp.eq.f32.partialorder %v2712_v24, inf  ;;  %vm231_vm2 = vcmp.eq.f32.partialorder %v2712_v24, 0.0  ;;  %v232_v42 = vand.u32 2147483648, %v2712_v24 }
  0x8b   :  { %2458 = vrsqrt.f32 %v2714_v25  ;;  %vm205_vm3 = vcmp.eq.f32.partialorder %v2714_v25, inf  ;;  %vm207_vm4 = vcmp.eq.f32.partialorder %v2714_v25, 0.0  ;;  %v208_v46 = vand.u32 2147483648, %v2714_v25 }
  0x8c   :  { %2460 = vrsqrt.f32 %v2717_v26  ;;  %vm149_vm5 = vcmp.eq.f32.partialorder %v2717_v26, inf  ;;  %vm151_vm6 = vcmp.eq.f32.partialorder %v2717_v26, 0.0  ;;  %v152_v53 = vand.u32 2147483648, %v2717_v26 }
  0x90   :  { %v2457_v27 = vpop.eup %2456 }
  0x91   :  { %v2459_v28 = vpop.eup %2458  ;;  %v223_v29 = vmul.f32 %v2457_v27, %v2712_v24  ;;  %v2722_v30 = vpop.xlane.xlu0 %181 }
  0x92   :  { %v2724_v31 = vpop.xlane.xlu1 %175  ;;  %v2461_v32 = vpop.eup %2460  ;;  %v199_v33 = vmul.f32 %v2459_v28, %v2714_v25  ;;  %2462 = vrsqrt.f32 %v2722_v30  ;;  %v220_v60 = vand.u32 2147483648, %v2722_v30  ;;  %vm217_vm7 = vcmp.eq.f32.partialorder %v2722_v30, inf }
  0x93   :  { %v2728_v34 = vpop.xlane.xlu2 %116  ;;  %v224_v35 = vmul.f32 %v2457_v27, %v223_v29  ;;  %v143_v36 = vmul.f32 %v2461_v32, %v2717_v26  ;;  %2464 = vrsqrt.f32 %v2724_v31  ;;  %v196_v63 = vand.u32 2147483648, %v2724_v31 }
  0x94   :  { %v200_v37 = vmul.f32 %v2459_v28, %v199_v33  ;;  %2466 = vrsqrt.f32 %v2728_v34  ;;  %vm219_vm8 = vcmp.eq.f32.partialorder %v2722_v30, 0.0  ;;  %vm193_vm9 = vcmp.eq.f32.partialorder %v2724_v31, inf }
  0x95   :  { %v225_v38 = vmul.f32 0.5, %v224_v35  ;;  %v144_v39 = vmul.f32 %v2461_v32, %v143_v36  ;;  %vm195_vm10 = vcmp.eq.f32.partialorder %v2724_v31, 0.0  ;;  %vm161_vm11 = vcmp.eq.f32.partialorder %v2728_v34, inf }
  0x96   :  { %v201_v40 = vmul.f32 0.5, %v200_v37  ;;  %vm163_vm12 = vcmp.eq.f32.partialorder %v2728_v34, 0.0 }
  0x97   :  { %v226_v41 = vsub.f32 1.5, %v225_v38  ;;  %v145_v43 = vmul.f32 0.5, %v144_v39 }
  0x98   :  { %v2463_v44 = vpop.eup %2462  ;;  %v202_v45 = vsub.f32 1.5, %v201_v40 }
  0x99   :  { %v2465_v47 = vpop.eup %2464  ;;  %v227_v48 = vmul.f32 %v2457_v27, %v226_v41  ;;  %v146_v49 = vsub.f32 1.5, %v145_v43  ;;  %v211_v50 = vmul.f32 %v2463_v44, %v2722_v30  ;;  %v2747_v55 = vpop.xlane.xlu0 %107 }
  0x9a   :  { %v2742_v51 = vpop.xlane.xlu1 %110  ;;  %v203_v52 = vmul.f32 %v2459_v28, %v202_v45  ;;  %v187_v54 = vmul.f32 %v2465_v47, %v2724_v31  ;;  %v2467_v56 = vpop.eup %2466  ;;  %vm125_vm15 = vcmp.eq.f32.partialorder %v2747_v55, inf }
  0x9b   :  { %2468 = vrsqrt.f32 %v2742_v51  ;;  %v228_v57 = vmul.f32 %v227_v48, %v2712_v24  ;;  %v147_v58 = vmul.f32 %v2461_v32, %v146_v49  ;;  %v212_v59 = vmul.f32 %v2463_v44, %v211_v50 }
  0x9c   :  { %v204_v61 = vmul.f32 %v203_v52, %v2714_v25  ;;  %v188_v62 = vmul.f32 %v2465_v47, %v187_v54  ;;  %v155_v3 = vmul.f32 %v2467_v56, %v2728_v34  ;;  %2470 = vrsqrt.f32 %v2747_v55 }
  0x9d   :  { %v230_v4 = vsel %vm229_vm1, %v2712_v24, %v228_v57  ;;  %v148_v5 = vmul.f32 %v147_v58, %v2717_v26  ;;  %v213_v8 = vmul.f32 0.5, %v212_v59  ;;  %v164_v32 = vand.u32 2147483648, %v2728_v34 }
  0x9e   :  { %v233_v9 = vsel %vm231_vm2, %v232_v42, %v230_v4  ;;  %v206_v10 = vsel %vm205_vm3, %v2714_v25, %v204_v61  ;;  %v189_v12 = vmul.f32 0.5, %v188_v62  ;;  %v156_v13 = vmul.f32 %v2467_v56, %v155_v3 }
  0x9f   :  { %v2768_v14 = vmax.f32 %v233_v9, 1e-12  ;;  %v209_v15 = vsel %vm207_vm4, %v208_v46, %v206_v10  ;;  %v150_v16 = vsel %vm149_vm5, %v2717_v26, %v148_v5  ;;  %v214_v17 = vsub.f32 1.5, %v213_v8 }
  0xa0   :  { %v2775_v21 = vmax.f32 %v209_v15, 1e-12  ;;  %v153_v22 = vsel %vm151_vm6, %v152_v53, %v150_v16  ;;  %v190_v23 = vsub.f32 1.5, %v189_v12  ;;  %v157_v24 = vmul.f32 0.5, %v156_v13 }
  0xa1   :  { %v2469_v20 = vpop.eup %2468  ;;  %2472 = vrcp.f32 %v2768_v14  ;;  %v215_v27 = vmul.f32 %v2463_v44, %v214_v17  ;;  %v2784_v35 = vmax.f32 %v153_v22, 1e-12  ;;  %vm137_vm13 = vcmp.eq.f32.partialorder %v2742_v51, inf }
  0xa2   :  { %v131_v25 = vmul.f32 %v2469_v20, %v2742_v51  ;;  %v191_v28 = vmul.f32 %v2465_v47, %v190_v23  ;;  %v158_v29 = vsub.f32 1.5, %v157_v24  ;;  %v2471_v33 = vpop.eup %2470  ;;  %2474 = vrcp.f32 %v2775_v21 }
  0xa3   :  { %v216_v26 = vmul.f32 %v215_v27, %v2722_v30  ;;  %v119_v39 = vmul.f32 %v2471_v33, %v2747_v55  ;;  %vm139_vm14 = vcmp.eq.f32.partialorder %v2742_v51, 0.0  ;;  %v140_v42 = vand.u32 2147483648, %v2742_v51 }
  0xa4   :  { %v132_v36 = vmul.f32 %v2469_v20, %v131_v25  ;;  %v192_v37 = vmul.f32 %v191_v28, %v2724_v31  ;;  %v159_v38 = vmul.f32 %v2467_v56, %v158_v29  ;;  %2476 = vrcp.f32 %v2784_v35 }
  0xa5   :  { %v218_v40 = vsel %vm217_vm7, %v2722_v30, %v216_v26  ;;  %v120_v46 = vmul.f32 %v2471_v33, %v119_v39  ;;  %vm127_vm1 = vcmp.eq.f32.partialorder %v2747_v55, 0.0  ;;  %v356_v57 = vand.u32 2147483647, %v2768_v14 }
  0xa6   :  { %v133_v41 = vmul.f32 0.5, %v132_v36  ;;  %v221_v43 = vsel %vm219_vm8, %v220_v60, %v218_v40  ;;  %v194_v44 = vsel %vm193_vm9, %v2724_v31, %v192_v37  ;;  %v160_v45 = vmul.f32 %v159_v38, %v2728_v34 }
  0xa7   :  { %v2473_v47 = vpop.eup %2472  ;;  %v2803_v48 = vmax.f32 %v221_v43, 1e-12  ;;  %v197_v49 = vsel %vm195_vm10, %v196_v63, %v194_v44  ;;  %v121_v53 = vmul.f32 0.5, %v120_v46  ;;  %v128_v63 = vand.u32 2147483648, %v2747_v55 }
  0xa8   :  { %v134_v50 = vsub.f32 1.5, %v133_v41  ;;  %v2808_v30 = vmax.f32 %v197_v49, 1e-12  ;;  %v162_v52 = vsel %vm161_vm11, %v2728_v34, %v160_v45  ;;  %v348_v54 = vmul.f32 %v2473_v47, %v2768_v14  ;;  %v2819_v58 = vpop.eup %2474 }
  0xa9   :  { %2478 = vrcp.f32 %v2803_v48  ;;  %v165_v31 = vsel %vm163_vm12, %v164_v32, %v162_v52  ;;  %v122_v60 = vsub.f32 1.5, %v121_v53  ;;  %vm353_vm2 = vweird.f32 %v2473_v47 }
  0xaa   :  { %v135_v56 = vmul.f32 %v2469_v20, %v134_v50  ;;  %2480 = vrcp.f32 %v2808_v30  ;;  %v2822_v59 = vmax.f32 %v165_v31, 1e-12  ;;  %v349_v61 = vsub.f32 1.0, %v348_v54  ;;  %v2829_v9 = vpop.eup %2476 }
  0xab   :  { %v358_v3 = vand.u32 2147483648, %v2768_v14  ;;  %v123_v34 = vmul.f32 %v2471_v33, %v122_v60  ;;  %v341_v5 = vand.u32 2147483647, %v2803_v48  ;;  %v343_v8 = vand.u32 2147483648, %v2803_v48 }
  0xac   :  { %v136_v62 = vmul.f32 %v135_v56, %v2742_v51  ;;  %v350_v4 = vmul.f32 %v2473_v47, %v349_v61  ;;  %vm352_vm3 = vweird.f32 %v2768_v14  ;;  %vm2835_vm4 = vcmp.eq.f32.partialorder %v356_v57, 8.507059e+37 }
  0xad   :  { %v318_v13 = vmul.f32 %v2819_v58, %v2775_v21  ;;  %2482 = vrcp.f32 %v2822_v59  ;;  %v124_v16 = vmul.f32 %v123_v34, %v2747_v55  ;;  %vm337_vm5 = vweird.f32 %v2803_v48  ;;  %vm354_vm6 = vmor %vm352_vm3, %vm353_vm2 }
  0xae   :  { %v138_v10 = vsel %vm137_vm13, %v2742_v51, %v136_v62  ;;  %v351_v17 = vadd.f32 %v2473_v47, %v350_v4  ;;  %v359_v14 = vor.u32 1.1754944e-38, %v358_v3  ;;  %v344_v23 = vor.u32 1.1754944e-38, %v343_v8 }
  0xaf   :  { %v141_v15 = vsel %vm139_vm14, %v140_v42, %v138_v10  ;;  %v2479_v20 = vpop.eup %2478  ;;  %v319_v24 = vsub.f32 1.0, %v318_v13  ;;  %v126_v25 = vsel %vm125_vm15, %v2747_v55, %v124_v16  ;;  %vm2853_vm7 = vcmp.eq.f32.partialorder %v341_v5, 8.507059e+37 }
  0xb0   :  { %v2846_v22 = vmax.f32 %v141_v15, 1e-12  ;;  %v2481_v27 = vpop.eup %2480  ;;  %v355_v51 = vsel %vm354_vm6, %v2473_v47, %v351_v17  ;;  %v333_v28 = vmul.f32 %v2479_v20, %v2803_v48  ;;  %vm322_vm8 = vweird.f32 %v2775_v21 }
  0xb1   :  { %v129_v32 = vsel %vm127_vm1, %v128_v63, %v126_v25  ;;  %v360_v33 = vsel %vm2835_vm4, %v359_v14, %v355_v51  ;;  %v320_v26 = vmul.f32 %v2819_v58, %v319_v24  ;;  %vm323_vm9 = vweird.f32 %v2819_v58 }
  0xb2   :  { %v2864_v36 = vmax.f32 %v129_v32, 1e-12  ;;  %v365_v37 = vmul.f32 %v360_v33, %v2672_v0  ;;  %v334_v38 = vsub.f32 1.0, %v333_v28  ;;  %v326_v39 = vand.u32 2147483647, %v2775_v21  ;;  %vm324_vm11 = vmor %vm322_vm8, %vm323_vm9 }
  0xb3   :  { %2484 = vrcp.f32 %v2846_v22  ;;  %v321_v40 = vadd.f32 %v2819_v58, %v320_v26  ;;  %v328_v55 = vand.u32 2147483648, %v2775_v21  ;;  %v303_v41 = vmul.f32 %v2481_v27, %v2808_v30  ;;  %v2872_v42 = vpop.eup %2482 }
  0xb4   :  { %2486 = vrcp.f32 %v2864_v36  ;;  %v388_v43 = vsel %vm105_vm0, %v365_v37, 0  ;;  %v335_v44 = vmul.f32 %v2479_v20, %v334_v38  ;;  %vm338_vm10 = vweird.f32 %v2479_v20 }
  0xb5   :  { %v2878_v0 = vand.u32 4294901760, %v388_v43  ;;  %v325_v45 = vsel %vm324_vm11, %v2819_v58, %v321_v40  ;;  %v329_v46 = vor.u32 1.1754944e-38, %v328_v55  ;;  %v304_v47 = vsub.f32 1.0, %v303_v41  ;;  %vm339_vm13 = vmor %vm337_vm5, %vm338_vm10 }
  0xb6   :  { %v336_v49 = vadd.f32 %v2479_v20, %v335_v44  ;;  %vm327_vm12 = vcmp.eq.f32.partialorder %v326_v39, 8.507059e+37  ;;  %v311_v50 = vand.u32 2147483647, %v2808_v30  ;;  %v313_v52 = vand.u32 2147483648, %v2808_v30 }
  0xb7   :  { %403 = vmatpush.xpose.msra.mxu0 %v2878_v0  ;;  %2440 = vmatpush.xpose.msra.mxu2 %v2878_v0  ;;  %v2888_v21 = vsub.f32 %v388_v43, %v2878_v0  ;;  %v330_v53 = vsel %vm327_vm12, %v329_v46, %v325_v45  ;;  %v305_v54 = vmul.f32 %v2481_v27, %v304_v47  ;;  %vm308_vm14 = vweird.f32 %v2481_v27 }
  0xb8   :  { %v340_v31 = vsel %vm339_vm13, %v2479_v20, %v336_v49  ;;  %v363_v56 = vmul.f32 %v330_v53, %v2674_v1  ;;  %vm307_vm15 = vweird.f32 %v2808_v30  ;;  %vm2892_vm1 = vcmp.eq.f32.partialorder %v311_v50, 8.507059e+37 }
  0xb9   :  { %v2896_v58 = vpop.eup %2484  ;;  %v345_v48 = vsel %vm2853_vm7, %v344_v23, %v340_v31  ;;  %v457_v60 = vand.u32 4294901760, %v2888_v21  ;;  %v306_v61 = vadd.f32 %v2481_v27, %v305_v54  ;;  %v269_v62 = vmul.f32 %v2829_v9, %v2784_v35  ;;  %vm309_vm2 = vmor %vm307_vm15, %vm308_vm14 }
  0xba   :  { %v2903_v63 = vpop.eup %2486  ;;  %v364_v1 = vmul.f32 %v345_v48, %v2684_v6  ;;  %v382_v30 = vsel %vm105_vm0, %v363_v56, 0  ;;  %v314_v3 = vor.u32 1.1754944e-38, %v313_v52  ;;  %v277_v34 = vand.u32 2147483647, %v2784_v35 }
  0xbb   :  { %v458_v4 = vsub.f32 %v2888_v21, %v457_v60  ;;  %v2911_v5 = vand.u32 4294901760, %v382_v30  ;;  %v310_v8 = vsel %vm309_vm2, %v2481_v27, %v306_v61  ;;  %v270_v10 = vsub.f32 1.0, %v269_v62 }
  0xbc   :  { %v385_v12 = vsel %vm105_vm0, %v364_v1, 0  ;;  %v315_v13 = vsel %vm2892_vm1, %v314_v3, %v310_v8  ;;  %vm274_vm3 = vweird.f32 %v2829_v9  ;;  %v279_v6 = vand.u32 2147483648, %v2784_v35 }
  0xbd   :  { %v2918_v15 = vand.u32 4294901760, %v385_v12  ;;  %v459_v16 = vand.u32 4294901760, %v458_v4  ;;  %v362_v17 = vmul.f32 %v315_v13, %v2686_v7  ;;  %v271_v20 = vmul.f32 %v2829_v9, %v270_v10 }
  0xbe   :  { %vm273_vm4 = vweird.f32 %v2784_v35  ;;  %vm2923_vm5 = vcmp.eq.f32.partialorder %v277_v34, 8.507059e+37  ;;  %v2928_v23 = vsub.f32 %v382_v30, %v2911_v5  ;;  %v239_v24 = vmul.f32 %v2903_v63, %v2864_v36 }
  0xbf   :  { %405 = vmatpush.xpose.msra.mxu0 %v2918_v15  ;;  %2441 = vmatpush.xpose.msra.mxu2 %v2918_v15  ;;  %v379_v7 = vsel %vm105_vm0, %v362_v17, 0  ;;  %v2936_v27 = vsub.f32 %v385_v12, %v2918_v15  ;;  %v272_v35 = vadd.f32 %v2829_v9, %v271_v20  ;;  %v280_v25 = vor.u32 1.1754944e-38, %v279_v6  ;;  %vm275_vm6 = vmor %vm273_vm4, %vm274_vm3 }
  0xc0   :  { %460 = vmatpush.xpose.msra.mxu1 %v459_v16  ;;  %2444 = vmatpush.xpose.msra.mxu3 %v459_v16  ;;  %v2939_v51 = vand.u32 4294901760, %v379_v7  ;;  %v469_v28 = vand.u32 4294901760, %v2928_v23  ;;  %v240_v29 = vsub.f32 1.0, %v239_v24  ;;  %v247_v32 = vand.u32 2147483647, %v2864_v36 }
  0xc1   :  { %v463_v33 = vand.u32 4294901760, %v2936_v27  ;;  %v276_v26 = vsel %vm275_vm6, %v2829_v9, %v272_v35  ;;  %v249_v37 = vand.u32 2147483648, %v2864_v36  ;;  %v284_v38 = vmul.f32 %v2872_v42, %v2822_v59 }
  0xc2   :  { %v281_v39 = vsel %vm2923_vm5, %v280_v25, %v276_v26  ;;  %v470_v40 = vsub.f32 %v2928_v23, %v469_v28  ;;  %v241_v55 = vmul.f32 %v2903_v63, %v240_v29  ;;  %vm244_vm7 = vweird.f32 %v2903_v63 }
  0xc3   :  { %407 = vmatpush.xpose.msra.mxu0 %v2911_v5  ;;  %2442 = vmatpush.xpose.msra.mxu2 %v2911_v5  ;;  %v464_v9 = vsub.f32 %v2936_v27, %v463_v33  ;;  %v300_v41 = vmul.f32 %v281_v39, %v2676_v2  ;;  %vm243_vm8 = vweird.f32 %v2864_v36  ;;  %v2963_v43 = vsub.f32 %v379_v7, %v2939_v51 }
  0xc4   :  { %v242_v44 = vadd.f32 %v2903_v63, %v241_v55  ;;  %vm248_vm9 = vcmp.eq.f32.partialorder %v247_v32, 8.507059e+37  ;;  %v250_v45 = vor.u32 1.1754944e-38, %v249_v37  ;;  %v285_v46 = vsub.f32 1.0, %v284_v38  ;;  %vm245_vm10 = vmor %vm243_vm8, %vm244_vm7 }
  0xc5   :  { %v465_v47 = vand.u32 4294901760, %v464_v9  ;;  %v373_v49 = vsel %vm105_vm0, %v300_v41, 0  ;;  %v475_v50 = vand.u32 4294901760, %v2963_v43  ;;  %vm289_vm11 = vweird.f32 %v2872_v42 }
  0xc6   :  { %v2969_v52 = vand.u32 4294901760, %v373_v49  ;;  %v246_v2 = vsel %vm245_vm10, %v2903_v63, %v242_v44  ;;  %v286_v36 = vmul.f32 %v2872_v42, %v285_v46  ;;  %v292_v53 = vand.u32 2147483647, %v2822_v59 }
  0xc7   :  { %409 = vmatpush.xpose.msra.mxu0 %v2939_v51  ;;  %2443 = vmatpush.xpose.msra.mxu2 %v2939_v51  ;;  %v471_v54 = vand.u32 4294901760, %v470_v40  ;;  %v251_v31 = vsel %vm248_vm9, %v250_v45, %v246_v2  ;;  %v294_v56 = vand.u32 2147483648, %v2822_v59  ;;  %v254_v57 = vmul.f32 %v2896_v58, %v2846_v22 }
  0xc8   :  { %466 = vmatpush.xpose.msra.mxu1 %v465_v47  ;;  %2445 = vmatpush.xpose.msra.mxu3 %v465_v47  ;;  %v2980_v48 = vsub.f32 %v373_v49, %v2969_v52  ;;  %v298_v61 = vmul.f32 %v251_v31, %v2704_v19  ;;  %v287_v62 = vadd.f32 %v2872_v42, %v286_v36  ;;  %vm288_vm12 = vweird.f32 %v2822_v59 }
  0xc9   :  { %v476_v63 = vsub.f32 %v2963_v43, %v475_v50  ;;  %vm290_vm13 = vmor %vm288_vm12, %vm289_vm11  ;;  %vm293_vm14 = vcmp.eq.f32.partialorder %v292_v53, 8.507059e+37  ;;  %v295_v1 = vor.u32 1.1754944e-38, %v294_v56  ;;  %v255_v30 = vsub.f32 1.0, %v254_v57 }
  0xca   :  { %v428_v19 = vand.u32 4294901760, %v2980_v48  ;;  %v367_v3 = vsel %vm105_vm0, %v298_v61, 0  ;;  %v291_v59 = vsel %vm290_vm13, %v2872_v42, %v287_v62  ;;  %vm259_vm15 = vweird.f32 %v2896_v58 }
  0xcb   :  { %510 = vmatpush.xpose.msrb.mxu2 %v2888_v21  ;;  %601 = vmatpush.xpose.msrb.mxu0 %v457_v60  ;;  %v2997_v21 = vand.u32 4294901760, %v367_v3  ;;  %v296_v60 = vsel %vm293_vm14, %v295_v1, %v291_v59  ;;  %v256_v34 = vmul.f32 %v2896_v58, %v255_v30  ;;  %v262_v4 = vand.u32 2147483647, %v2846_v22 }
  0xcc   :  { %v429_v8 = vsub.f32 %v2980_v48, %v428_v19  ;;  %472 = vmatpush.xpose.msra.mxu1 %v471_v54  ;;  %2446 = vmatpush.xpose.msra.mxu3 %v471_v54  ;;  %v301_v10 = vmul.f32 %v296_v60, %v2691_v11  ;;  %v264_v12 = vand.u32 2147483648, %v2846_v22  ;;  %vm258_vm1 = vweird.f32 %v2846_v22 }
  0xcd   :  { %v411_v42 = vsub.f32 %v367_v3, %v2997_v21  ;;  %v257_v13 = vadd.f32 %v2896_v58, %v256_v34  ;;  %v477_v16 = vand.u32 4294901760, %v476_v63  ;;  %vm260_vm2 = vmor %vm258_vm1, %vm259_vm15  ;;  %vm263_vm3 = vcmp.eq.f32.partialorder %v262_v4, 8.507059e+37 }
  0xce   :  { %v430_v6 = vand.u32 4294901760, %v429_v8  ;;  %v376_v17 = vsel %vm105_vm0, %v301_v10, 0  ;;  %v265_v20 = vor.u32 1.1754944e-38, %v264_v12  ;;  %v2628_v37 = vmov 1.0  }
  0xcf   :  { %513 = vmatpush.xpose.msrb.mxu2 %v2936_v27  ;;  %605 = vmatpush.xpose.msrb.mxu0 %v463_v33  ;;  %v412_v11 = vand.u32 4294901760, %v411_v42  ;;  %v3013_v14 = vand.u32 4294901760, %v376_v17  ;;  %v261_v24 = vsel %vm260_vm2, %v2896_v58, %v257_v13  ;;  %vm2416_vm4 = vcmask 7168  }
  0xd0   :  { %431 = vmatmul.f32.vlgmr.msra.gmra.mxu2 %v430_v6  ;;  %478 = vmatpush.xpose.msra.mxu1 %v477_v16  ;;  %v266_v7 = vsel %vm263_vm3, %v265_v20, %v261_v24 }
  0xd1   :  { %v413_v27 = vsub.f32 %v411_v42, %v412_v11  ;;  %2447 = vmatpush.xpose.msra.mxu3 %v477_v16  ;;  %v3018_v22 = vsub.f32 %v376_v17, %v3013_v14  ;;  %v299_v35 = vmul.f32 %v266_v7, %v2702_v18 }
  0xd3   :  { %516 = vmatpush.xpose.msrb.mxu2 %v2928_v23  ;;  %609 = vmatpush.xpose.msrb.mxu0 %v469_v28  ;;  %v414_v25 = vand.u32 4294901760, %v413_v27  ;;  %v436_v58 = vand.u32 4294901760, %v3018_v22  ;;  %v370_v29 = vsel %vm105_vm0, %v299_v35, 0 }
  0xd4   :  { %644 = vmatpush.xpose.msrb.mxu1 %v2878_v0  ;;  %488 = vmatmul.f32.vlgmr.msra.gmra.mxu3 %v2969_v52  ;;  %v418_v32 = vand.u32 4294901760, %v370_v29 }
  0xd5   :  { %554 = vmatpush.xpose.msrb.mxu3 %v2878_v0  ;;  %480 = vmatmul.f32.vlgmr.msra.gmra.mxu1 %v2997_v21  ;;  %v437_v18 = vsub.f32 %v3018_v22, %v436_v58 }
  0xd6   :  { %415 = vmatmul.f32.vlgmr.msra.gmra.mxu0 %v414_v25  ;;  %v419_v0 = vsub.f32 %v370_v29, %v418_v32 }
  0xd7   :  { %519 = vmatpush.xpose.msrb.mxu2 %v2963_v43  ;;  %613 = vmatpush.xpose.msrb.mxu0 %v475_v50  ;;  %v438_v23 = vand.u32 4294901760, %v437_v18 }
  0xd8   :  { %646 = vmatpush.xpose.msrb.mxu1 %v2918_v15  ;;  %v420_v28 = vand.u32 4294901760, %v419_v0 }
  0xd9   :  { %556 = vmatpush.xpose.msrb.mxu3 %v2918_v15  ;;  %439 = vmatmul.f32.gmra.mxu2 %v438_v23  ;;  %v92_v15 = vld [vmem:[#allocation7] sm:$0xff] }
  0xda   :  { %v421_v33 = vsub.f32 %v419_v0, %v420_v28  ;;  %v93_v38 = vunpack.c.0.s8 %v92_v15  ;;  %v94_v40 = vunpack.c.1.s8 %v92_v15  ;;  %v95_v44 = vunpack.c.2.s8 %v92_v15 }
  0xdb   :  { %700 = vmatpush.msra.mxu2 %v2628_v37  ;;  %v96_v36 = vunpack.c.3.s8 %v92_v15 }
  0xdc   :  { %648 = vmatpush.xpose.msrb.mxu1 %v2911_v5  ;;  %v422_v26 = vand.u32 4294901760, %v421_v33  ;;  %492 = vmatmul.f32.gmra.mxu3 %v3013_v14  ;;  %v3068_v9 = vcvt.s32.f32 %v94_v40  ;;  %v3080_v47 = vcvt.s32.f32 %v95_v44 }
  0xdd   :  { %558 = vmatpush.xpose.msrb.mxu3 %v2911_v5  ;;  %484 = vmatmul.f32.gmra.mxu1 %v418_v32  ;;  %v2629_v5 = vmov 0.0  }
  0xde   :  { %423 = vmatmul.f32.gmra.mxu0 %v422_v26  ;;  %701 = vmatpush.msra.mxu2 %v2628_v37  ;;  %v680_v43 = vsel %vm105_vm0, %v3068_v9, 0  ;;  %v683_v2 = vsel %vm105_vm0, %v3080_v47, 0 }
  0xdf   :  { %785 = vmatpush.msra.mxu0 %v2629_v5  ;;  %v712_v46 = vand.u32 4294901760, %v680_v43  ;;  %v720_v31 = vand.u32 4294901760, %v683_v2 }
  0xe0   :  { %650 = vmatpush.xpose.msrb.mxu1 %v2939_v51  ;;  %702 = vmatpush.msra.mxu2 %v2628_v37 }
  0xe1   :  { %560 = vmatpush.xpose.msrb.mxu3 %v2939_v51  ;;  %522 = vmatmul.f32.vlgmr.msrb.gmra.mxu2 %v411_v42  ;;  %v3052_v51 = vcvt.s32.f32 %v93_v38  ;;  %v713_v50 = vsub.f32 %v680_v43, %v712_v46  ;;  %v721_v57 = vsub.f32 %v683_v2, %v720_v31 }
  0xe2   :  { %703 = vmatpush.msra.mxu2 %v2628_v37 }
  0xe3   :  { %v677_v39 = vsel %vm105_vm0, %v3052_v51, 0  ;;  %v714_v54 = vand.u32 4294901760, %v713_v50  ;;  %v722_v62 = vand.u32 4294901760, %v721_v57 }
  0xe4   :  { %819 = vmatpush.msra.mxu1 %v2628_v37  ;;  %564 = vmatmul.f32.vlgmr.msrb.gmra.mxu3 %v412_v11  ;;  %v3065_v55 = vand.u32 4294901760, %v677_v39 }
  0xe5   :  { %752 = vmatpush.msra.mxu3 %v2629_v5  ;;  %652 = vmatmul.f32.vlgmr.msrb.gmra.mxu1 %v2997_v21  ;;  %v715_v56 = vsub.f32 %v713_v50, %v714_v54  ;;  %v723_v1 = vsub.f32 %v721_v57, %v722_v62 }
  0xe6   :  { %820 = vmatpush.msra.mxu1 %v2628_v37  ;;  %615 = vmatmul.f32.vlgmr.msrb.gmra.mxu0 %v2997_v21  ;;  %v705_v41 = vsub.f32 %v677_v39, %v3065_v55 }
  0xe7   :  { %893 = vmatpush.msrb.mxu3 %v2628_v37  ;;  %863 = vmatpush.msrb.mxu2 %v2629_v5  ;;  %v716_v61 = vand.u32 4294901760, %v715_v56 }
  0xe8   :  { %821 = vmatpush.msra.mxu1 %v2628_v37  ;;  %938 = vmatpush.msrb.mxu0 %v2628_v37  ;;  %v706_v45 = vand.u32 4294901760, %v705_v41 }
  0xe9   :  { %894 = vmatpush.msrb.mxu3 %v2628_v37  ;;  %527 = vmatmul.f32.gmra.mxu2 %v419_v0 }
  0xea   :  { %822 = vmatpush.msra.mxu1 %v2628_v37  ;;  %939 = vmatpush.msrb.mxu0 %v2628_v37  ;;  %v707_v49 = vsub.f32 %v705_v41, %v706_v45 }
  0xeb   :  { %895 = vmatpush.msrb.mxu3 %v2628_v37 }
  0xec   :  { %990 = vmatpush.msrb.mxu1 %v2629_v5  ;;  %570 = vmatmul.f32.gmra.mxu3 %v420_v28  ;;  %v708_v53 = vand.u32 4294901760, %v707_v49 }
  0xed   :  { %896 = vmatpush.msrb.mxu3 %v2628_v37  ;;  %656 = vmatmul.f32.gmra.mxu1 %v418_v32 }
  0xee   :  { %619 = vmatmul.f32.gmra.mxu0 %v418_v32 }
  0xef   :  { %940 = vmatpush.msrb.mxu0 %v2628_v37 }
  0xf1   :  { %532 = vmatmul.f32.gmra.mxu2 %v2980_v48  ;;  %941 = vmatpush.msrb.mxu0 %v2628_v37 }
  0xf4   :  { %576 = vmatmul.f32.gmra.mxu3 %v428_v19  ;;  %v724_v19 = vand.u32 4294901760, %v723_v1 }
  0xf5   :  { %660 = vmatmul.f32.gmra.mxu1 %v2969_v52 }
  0xf6   :  { %623 = vmatmul.f32.gmra.mxu0 %v2969_v52  ;;  %v3089_v52 = vcvt.s32.f32 %v96_v36  ;;  %v89_v36 = vld [vmem:[#allocation6 + $0x8] sm:$0xff] }
  0xf7   :  { %v673_v1 = vmul.f32 %v3068_v9, %v89_v36 }
  0xf8   :  { %v686_v48 = vsel %vm105_vm0, %v3089_v52, 0 }
  0xf9   :  { %537 = vmatmul.f32.gmra.mxu2 %v3018_v22  ;;  %v728_v63 = vand.u32 4294901760, %v686_v48 }
  0xfb   :  { %v729_v30 = vsub.f32 %v686_v48, %v728_v63 }
  0xfc   :  { %582 = vmatmul.f32.gmra.mxu3 %v436_v58  ;;  %v88_v58 = vld [vmem:[#allocation6] sm:$0xff] }
  0xfd   :  { %664 = vmatmul.f32.gmra.mxu1 %v3013_v14  ;;  %v730_v3 = vand.u32 4294901760, %v729_v30  ;;  %v672_v40 = vmul.f32 %v3052_v51, %v88_v58 }
  0xfe   :  { %627 = vmatmul.f32.gmra.mxu0 %v3013_v14 }
  0xff   :  { %v731_v59 = vsub.f32 %v729_v30, %v730_v3 }
 0x101   :  { %709 = vmatmul.f32.vlgmr.msra.gmra.mxu2 %v708_v53  ;;  %v732_v21 = vand.u32 4294901760, %v731_v59 }
 0x102   :  { %1023 = vmatpush.msra.mxu2 %v2629_v5 }
 0x104   :  { %754 = vmatmul.f32.vlgmr.msra.gmra.mxu3 %v3065_v55 }
 0x105   :  { %826 = vmatmul.f32.vlgmr.msra.gmra.mxu1 %v706_v45  ;;  %1057 = vmatpush.msra.mxu3 %v2628_v37  ;;  %v3123_v45 = vmul.f32 %v672_v40, %v88_v58 }
 0x106   :  { %1131 = vmatpush.msra.mxu1 %v2628_v37  ;;  %788 = vmatmul.f32.vlgmr.msra.gmra.mxu0 %v705_v41 }
 0x107   :  { %1058 = vmatpush.msra.mxu3 %v2628_v37  ;;  %1101 = vmatpush.msra.mxu0 %v2629_v5 }
 0x108   :  { %1132 = vmatpush.msra.mxu1 %v2628_v37 }
 0x109   :  { %717 = vmatmul.f32.gmra.mxu2 %v716_v61  ;;  %1059 = vmatpush.msra.mxu3 %v2628_v37 }
 0x10a   :  { %1133 = vmatpush.msra.mxu1 %v2628_v37 }
 0x10b   :  { %1060 = vmatpush.msra.mxu3 %v2628_v37 }
 0x10c   :  { %758 = vmatmul.f32.gmra.mxu3 %v712_v46  ;;  %1134 = vmatpush.msra.mxu1 %v2628_v37 }
 0x10d   :  { %832 = vmatmul.f32.gmra.mxu1 %v714_v54 }
 0x10e   :  { %793 = vmatmul.f32.gmra.mxu0 %v713_v50 }
 0x111   :  { %725 = vmatmul.f32.gmra.mxu2 %v724_v19 }
 0x114   :  { %762 = vmatmul.f32.gmra.mxu3 %v720_v31 }
 0x115   :  { %838 = vmatmul.f32.gmra.mxu1 %v722_v62 }
 0x116   :  { %798 = vmatmul.f32.gmra.mxu0 %v721_v57 }
 0x119   :  { %733 = vmatmul.f32.gmra.mxu2 %v732_v21  ;;  %v3144_v21 = vmul.f32 %v673_v1, %v89_v36 }
 0x11c   :  { %766 = vmatmul.f32.gmra.mxu3 %v728_v63 }
 0x11d   :  { %844 = vmatmul.f32.gmra.mxu1 %v730_v3 }
 0x11e   :  { %803 = vmatmul.f32.gmra.mxu0 %v729_v30 }
 0x121   :  { %865 = vmatmul.f32.vlgmr.msrb.gmra.mxu2 %v3065_v55 }
 0x122   :  { %1176 = vmatpush.msrb.mxu2 %v2628_v37 }
 0x124   :  { %898 = vmatmul.f32.vlgmr.msrb.gmra.mxu3 %v3065_v55  ;;  %1177 = vmatpush.msrb.mxu2 %v2628_v37 }
 0x125   :  { %1228 = vmatpush.msrb.mxu3 %v2629_v5 }
 0x126   :  { %1178 = vmatpush.msrb.mxu2 %v2628_v37 }
 0x128   :  { %1179 = vmatpush.msrb.mxu2 %v2628_v37 }
 0x129   :  { %869 = vmatmul.f32.gmra.mxu2 %v712_v46 }
 0x12c   :  { %902 = vmatmul.f32.gmra.mxu3 %v712_v46 }
 0x131   :  { %873 = vmatmul.f32.gmra.mxu2 %v720_v31 }
 0x134   :  { %906 = vmatmul.f32.gmra.mxu3 %v720_v31 }
 0x139   :  { %877 = vmatmul.f32.gmra.mxu2 %v728_v63 }
 0x13c   :  { %910 = vmatmul.f32.gmra.mxu3 %v728_v63 }
 0x152   :  { %v481_v60 = vpop.f32.mrf.mxu1 }
 0x153   :  { %v416_v34 = vpop.f32.mrf.mxu0  ;;  %v432_v4 = vpop.f32.mrf.mxu2 }
 0x154   :  { %v482_v16 = vadd.f32 %v481_v60, %v416_v34 }
 0x157   :  { %v489_v8 = vpop.f32.mrf.mxu3 }
 0x158   :  { %v490_v55 = vadd.f32 %v489_v8, %v432_v4  ;;  %v1153_v4 = vsel %vm105_vm0, %v672_v40, 0 }
 0x15a   :  { %v485_v12 = vpop.f32.mrf.mxu1 }
 0x15b   :  { %v424_v10 = vpop.f32.mrf.mxu0 }
 0x15c   :  { %v440_v42 = vpop.f32.mrf.mxu2  ;;  %v486_v27 = vadd.f32 %v485_v12, %v424_v10  ;;  %v90_v10 = vld [vmem:[#allocation6 + $0x10] sm:$0xff] }
 0x15f   :  { %v493_v13 = vpop.f32.mrf.mxu3 }
 0x160   :  { %v494_v30 = vadd.f32 %v493_v13, %v440_v42 }
 0x162   :  { %v653_v20 = vpop.f32.mrf.mxu1 }
 0x163   :  { %v616_v6 = vpop.f32.mrf.mxu0 }
 0x164   :  { %v523_v17 = vpop.f32.mrf.mxu2 }
 0x165   :  { %v524_v11 = vadd.f32 %v523_v17, %v482_v16 }
 0x167   :  { %v565_v14 = vpop.f32.mrf.mxu3 }
 0x168   :  { %v566_v24 = vadd.f32 %v565_v14, %v524_v11 }
 0x16a   :  { %v617_v7 = vadd.f32 %v616_v6, %v566_v24  ;;  %v657_v18 = vpop.f32.mrf.mxu1 }
 0x16b   :  { %v620_v25 = vpop.f32.mrf.mxu0 }
 0x16c   :  { %v528_v22 = vpop.f32.mrf.mxu2  ;;  %v654_v35 = vadd.f32 %v653_v20, %v617_v7  ;;  %v3154_v20 = vand.u32 4294901760, %v1153_v4 }
 0x16d   :  { %v529_v29 = vadd.f32 %v528_v22, %v486_v27  ;;  %v674_v27 = vmul.f32 %v3080_v47, %v90_v10 }
 0x16e   :  { %v668_v32 = vmul.f32 %v654_v35, %v3052_v51 }
 0x16f   :  { %v571_v0 = vpop.f32.mrf.mxu3 }
 0x170   :  { %v3112_v23 = vmul.f32 %v668_v32, %v654_v35  ;;  %v3114_v28 = vmul.f32 %v668_v32, %v88_v58  ;;  %v572_v33 = vadd.f32 %v571_v0, %v529_v29  ;;  %v915_v26 = vsel %vm105_vm0, %v668_v32, 0 }
 0x171   :  { %v3117_v15 = vand.u32 4294901760, %v915_v26  ;;  %v3164_v58 = vmul.f32 %v674_v27, %v90_v10 }
 0x172   :  { %v621_v38 = vadd.f32 %v620_v25, %v572_v33  ;;  %v661_v56 = vpop.f32.mrf.mxu1  ;;  %v3162_v25 = vsub.f32 %v1153_v4, %v3154_v20 }
 0x173   :  { %992 = vmatmul.f32.vlgmr.msrb.gmra.mxu1 %v3117_v15  ;;  %v943_v39 = vsub.f32 %v915_v26, %v3117_v15  ;;  %v624_v50 = vpop.f32.mrf.mxu0  ;;  %v91_v26 = vld [vmem:[#allocation6 + $0x18] sm:$0xff] }
 0x174   :  { %v533_v41 = vpop.f32.mrf.mxu2  ;;  %v658_v43 = vadd.f32 %v657_v18, %v621_v38  ;;  %1295 = vmatpush.msrb.mxu1 %v2628_v37  ;;  %v1156_v18 = vsel %vm105_vm0, %v673_v1, 0 }
 0x175   :  { %1026 = vmatmul.f32.vlgmr.msra.gmra.mxu2 %v943_v39  ;;  %v944_v44 = vand.u32 4294901760, %v943_v39  ;;  %v534_v46 = vadd.f32 %v533_v41, %v490_v55  ;;  %v1182_v55 = vand.u32 4294901760, %v3162_v25  ;;  %v3174_v41 = vand.u32 4294901760, %v1156_v18 }
 0x176   :  { %v669_v49 = vmul.f32 %v658_v43, %v3068_v9  ;;  %1296 = vmatpush.msrb.mxu1 %v2628_v37  ;;  %1339 = vmatpush.msra.mxu2 %v2629_v5 }
 0x177   :  { %v577_v2 = vpop.f32.mrf.mxu3  ;;  %1064 = vmatmul.f32.vlgmr.msra.gmra.mxu3 %v944_v44  ;;  %v945_v51 = vsub.f32 %v943_v39, %v944_v44 }
 0x178   :  { %v3128_v53 = vmul.f32 %v669_v49, %v658_v43  ;;  %v578_v54 = vadd.f32 %v577_v2, %v534_v46  ;;  %v918_v31 = vsel %vm105_vm0, %v669_v49, 0  ;;  %1297 = vmatpush.msrb.mxu1 %v2628_v37  ;;  %1369 = vmatpush.msra.mxu3 %v2628_v37  ;;  %v3137_v62 = vmul.f32 %v669_v49, %v89_v36 }
 0x179   :  { %v946_v57 = vand.u32 4294901760, %v945_v51  ;;  %v3133_v48 = vand.u32 4294901760, %v918_v31  ;;  %v675_v46 = vmul.f32 %v3089_v52, %v91_v26  ;;  %v3185_v2 = vsub.f32 %v1156_v18, %v3174_v41 }
 0x17a   :  { %v625_v61 = vadd.f32 %v624_v50, %v578_v54  ;;  %1298 = vmatpush.msrb.mxu1 %v2628_v37  ;;  %1370 = vmatpush.msra.mxu3 %v2628_v37  ;;  %v665_v24 = vpop.f32.mrf.mxu1  ;;  %v1183_v50 = vsub.f32 %v3162_v25, %v1182_v55  ;;  %v1159_v54 = vsel %vm105_vm0, %v674_v27, 0 }
 0x17b   :  { %947 = vmatmul.f32.vlgmr.msrb.gmra.mxu0 %v946_v57  ;;  %996 = vmatmul.f32.gmra.mxu1 %v3133_v48  ;;  %v951_v63 = vsub.f32 %v918_v31, %v3133_v48  ;;  %v628_v6 = vpop.f32.mrf.mxu0  ;;  %v3187_v51 = vmul.f32 %v675_v46, %v91_v26 }
 0x17c   :  { %v538_v19 = vpop.f32.mrf.mxu2  ;;  %v662_v3 = vadd.f32 %v661_v56, %v625_v61  ;;  %1261 = vmatpush.msrb.mxu0 %v2629_v5  ;;  %1371 = vmatpush.msra.mxu3 %v2628_v37  ;;  %v1184_v61 = vand.u32 4294901760, %v1183_v50 }
 0x17d   :  { %1031 = vmatmul.f32.gmra.mxu2 %v951_v63  ;;  %v952_v59 = vand.u32 4294901760, %v951_v63  ;;  %v539_v60 = vadd.f32 %v538_v19, %v494_v30 }
 0x17e   :  { %v670_v34 = vmul.f32 %v662_v3, %v3080_v47  ;;  %1372 = vmatpush.msra.mxu3 %v2628_v37 }
 0x17f   :  { %v583_v8 = vpop.f32.mrf.mxu3  ;;  %1070 = vmatmul.f32.gmra.mxu3 %v952_v59  ;;  %v953_v9 = vsub.f32 %v951_v63, %v952_v59  ;;  %v3191_v63 = vand.u32 4294901760, %v1159_v54 }
 0x180   :  { %v3149_v12 = vmul.f32 %v670_v34, %v662_v3  ;;  %v584_v42 = vadd.f32 %v583_v8, %v539_v60  ;;  %v921_v13 = vsel %vm105_vm0, %v670_v34, 0  ;;  %v3156_v14 = vmul.f32 %v670_v34, %v90_v10 }
 0x181   :  { %v954_v16 = vand.u32 4294901760, %v953_v9  ;;  %v3152_v17 = vand.u32 4294901760, %v921_v13  ;;  %v3199_v30 = vsub.f32 %v1159_v54, %v3191_v63  ;;  %v1162_v3 = vsel %vm105_vm0, %v675_v46, 0 }
 0x182   :  { %v629_v11 = vadd.f32 %v628_v6, %v584_v42  ;;  %v3206_v4 = vand.u32 4294901760, %v1162_v3 }
 0x183   :  { %955 = vmatmul.f32.gmra.mxu0 %v954_v16  ;;  %1000 = vmatmul.f32.gmra.mxu1 %v3152_v17  ;;  %v959_v7 = vsub.f32 %v921_v13, %v3152_v17  ;;  %v1198_v34 = vand.u32 4294901760, %v3199_v30  ;;  %v789_v13 = vpop.f32.mrf.mxu0 }
 0x184   :  { %v666_v22 = vadd.f32 %v665_v24, %v629_v11  ;;  %v710_v29 = vpop.f32.mrf.mxu2  ;;  %v3217_v10 = vsub.f32 %v1162_v3, %v3206_v4  ;;  %v827_v24 = vpop.f32.mrf.mxu1 }
 0x185   :  { %1036 = vmatmul.f32.gmra.mxu2 %v959_v7  ;;  %v960_v35 = vand.u32 4294901760, %v959_v7  ;;  %v1199_v9 = vsub.f32 %v3199_v30, %v1198_v34 }
 0x186   :  { %v671_v32 = vmul.f32 %v666_v22, %v3089_v52  ;;  %v1190_v52 = vand.u32 4294901760, %v3185_v2  ;;  %v1206_v11 = vand.u32 4294901760, %v3217_v10 }
 0x187   :  { %1076 = vmatmul.f32.gmra.mxu3 %v960_v35  ;;  %v961_v0 = vsub.f32 %v959_v7, %v960_v35  ;;  %v755_v33 = vpop.f32.mrf.mxu3  ;;  %v1200_v16 = vand.u32 4294901760, %v1199_v9 }
 0x188   :  { %v3168_v38 = vmul.f32 %v671_v32, %v666_v22  ;;  %v924_v47 = vsel %vm105_vm0, %v671_v32, 0  ;;  %v3176_v43 = vmul.f32 %v671_v32, %v91_v26  ;;  %v1191_v1 = vsub.f32 %v3185_v2, %v1190_v52 }
 0x189   :  { %v962_v39 = vand.u32 4294901760, %v961_v0  ;;  %v3171_v40 = vand.u32 4294901760, %v924_v47  ;;  %v756_v8 = vadd.f32 %v755_v33, %v710_v29  ;;  %v1207_v22 = vsub.f32 %v3217_v10, %v1206_v11 }
 0x18a   :  { %v1192_v60 = vand.u32 4294901760, %v1191_v1 }
 0x18b   :  { %963 = vmatmul.f32.gmra.mxu0 %v962_v39  ;;  %1004 = vmatmul.f32.gmra.mxu1 %v3171_v40  ;;  %v967_v44 = vsub.f32 %v924_v47, %v3171_v40  ;;  %v790_v6 = vadd.f32 %v789_v13, %v756_v8  ;;  %v794_v18 = vpop.f32.mrf.mxu0  ;;  %v1398_v13 = vsel %vm105_vm0, %v3128_v53, 0 }
 0x18c   :  { %v718_v36 = vpop.f32.mrf.mxu2  ;;  %v833_v47 = vpop.f32.mrf.mxu1 }
 0x18d   :  { %1041 = vmatmul.f32.gmra.mxu2 %v967_v44  ;;  %v968_v49 = vand.u32 4294901760, %v967_v44  ;;  %v828_v27 = vadd.f32 %v827_v24, %v790_v6  ;;  %v1404_v24 = vsel %vm105_vm0, %v3168_v38, 0 }
 0x18f   :  { %1082 = vmatmul.f32.gmra.mxu3 %v968_v49  ;;  %v969_v31 = vsub.f32 %v967_v44, %v968_v49  ;;  %v759_v56 = vpop.f32.mrf.mxu3 }
 0x190   :  { %v760_v7 = vadd.f32 %v759_v56, %v718_v36 }
 0x191   :  { %v970_v57 = vand.u32 4294901760, %v969_v31 }
 0x192   :  { %v795_v33 = vadd.f32 %v794_v18, %v760_v7  ;;  %v1637_v7 = vsel %vm105_vm0, %v3123_v45, 0  ;;  %v1640_v45 = vsel %vm105_vm0, %v3144_v21, 0  ;;  %v1643_v21 = vsel %vm105_vm0, %v3164_v58, 0 }
 0x193   :  { %971 = vmatmul.f32.gmra.mxu0 %v970_v57  ;;  %1136 = vmatmul.f32.vlgmr.msra.gmra.mxu1 %v3117_v15  ;;  %v799_v50 = vpop.f32.mrf.mxu0 }
 0x194   :  { %1470 = vmatpush.msra.mxu1 %v2629_v5  ;;  %v726_v19 = vpop.f32.mrf.mxu2  ;;  %v834_v44 = vadd.f32 %v833_v47, %v795_v33  ;;  %v839_v56 = vpop.f32.mrf.mxu1 }
 0x195   :  { %1185 = vmatmul.f32.vlgmr.msrb.gmra.mxu2 %v1184_v61 }
 0x196   :  { %1503 = vmatpush.msrb.mxu2 %v2629_v5 }
 0x197   :  { %1230 = vmatmul.f32.vlgmr.msrb.gmra.mxu3 %v3154_v20  ;;  %v763_v59 = vpop.f32.mrf.mxu3 }
 0x198   :  { %1537 = vmatpush.msrb.mxu3 %v2628_v37  ;;  %v764_v39 = vadd.f32 %v763_v59, %v726_v19 }
 0x19a   :  { %1538 = vmatpush.msrb.mxu3 %v2628_v37  ;;  %v800_v54 = vadd.f32 %v799_v50, %v764_v39  ;;  %v3352_v39 = vand.u32 4294901760, %v1640_v45 }
 0x19b   :  { %1103 = vmatmul.f32.vlgmr.msra.gmra.mxu0 %v3117_v15  ;;  %1140 = vmatmul.f32.gmra.mxu1 %v3133_v48  ;;  %v804_v19 = vpop.f32.mrf.mxu0 }
 0x19c   :  { %1418 = vmatpush.msra.mxu0 %v2628_v37  ;;  %1539 = vmatpush.msrb.mxu3 %v2628_v37  ;;  %v734_v42 = vpop.f32.mrf.mxu2  ;;  %v840_v61 = vadd.f32 %v839_v56, %v800_v54 }
 0x19d   :  { %1193 = vmatmul.f32.gmra.mxu2 %v1192_v60  ;;  %v845_v60 = vpop.f32.mrf.mxu1 }
 0x19e   :  { %1419 = vmatpush.msra.mxu0 %v2628_v37  ;;  %1540 = vmatpush.msrb.mxu3 %v2628_v37 }
 0x19f   :  { %1234 = vmatmul.f32.gmra.mxu3 %v3174_v41  ;;  %v767_v15 = vpop.f32.mrf.mxu3 }
 0x1a0   :  { %1420 = vmatpush.msra.mxu0 %v2628_v37  ;;  %v768_v57 = vadd.f32 %v767_v15, %v734_v42 }
 0x1a2   :  { %1421 = vmatpush.msra.mxu0 %v2628_v37  ;;  %v805_v59 = vadd.f32 %v804_v19, %v768_v57  ;;  %v3364_v57 = vand.u32 4294901760, %v1643_v21 }
 0x1a3   :  { %1107 = vmatmul.f32.gmra.mxu0 %v3133_v48  ;;  %1144 = vmatmul.f32.gmra.mxu1 %v3152_v17  ;;  %v1208_v48 = vand.u32 4294901760, %v1207_v22 }
 0x1a4   :  { %v866_v35 = vpop.f32.mrf.mxu2  ;;  %v846_v8 = vadd.f32 %v845_v60, %v805_v59  ;;  %v3372_v58 = vsub.f32 %v1643_v21, %v3364_v57 }
 0x1a5   :  { %1201 = vmatmul.f32.gmra.mxu2 %v1200_v16  ;;  %v867_v29 = vadd.f32 %v866_v35, %v828_v27  ;;  %v1401_v16 = vsel %vm105_vm0, %v3149_v12, 0  ;;  %v3340_v35 = vand.u32 4294901760, %v1404_v24 }
 0x1a7   :  { %1238 = vmatmul.f32.gmra.mxu3 %v3191_v63  ;;  %v899_v32 = vpop.f32.mrf.mxu3  ;;  %v1447_v18 = vsub.f32 %v1404_v24, %v3340_v35 }
 0x1a8   :  { %v3231_v0 = vadd.f32 %v899_v32, %v867_v29  ;;  %v3342_v29 = vand.u32 4294901760, %v1637_v7 }
 0x1aa   :  { %vm2400_vm5 = vcmp.ge.f32.partialorder %v3231_v0, 2.0  ;;  %v3347_v38 = vsub.f32 %v1637_v7, %v3342_v29 }
 0x1ab   :  { %1111 = vmatmul.f32.gmra.mxu0 %v3152_v17  ;;  %1148 = vmatmul.f32.gmra.mxu1 %v3171_v40  ;;  %v3237_v26 = vsel %vm2400_vm5, 1.0, %v2629_v5 }
 0x1ac   :  { %2421 = vst.msk [vmem:[%s3843_s5] sm:$0xff] %vm2416_vm4, %v3237_v26  ;;  %v870_v46 = vpop.f32.mrf.mxu2  ;;  %v1666_v47 = vand.u32 4294901760, %v3347_v38 }
 0x1ad   :  { %1209 = vmatmul.f32.gmra.mxu2 %v1208_v48  ;;  %v871_v49 = vadd.f32 %v870_v46, %v834_v44  ;;  %v1448_v48 = vand.u32 4294901760, %v1447_v18 }
 0x1ae   :  { %v1667_v46 = vsub.f32 %v3347_v38, %v1666_v47 }
 0x1af   :  { %1242 = vmatmul.f32.gmra.mxu3 %v3206_v4  ;;  %v903_v17 = vpop.f32.mrf.mxu3  ;;  %v1449_v44 = vsub.f32 %v1447_v18, %v1448_v48 }
 0x1b0   :  { %v3245_v36 = vadd.f32 %v903_v17, %v871_v49  ;;  %v3359_v49 = vsub.f32 %v1640_v45, %v3352_v39  ;;  %v1668_v54 = vand.u32 4294901760, %v1667_v46 }
 0x1b1   :  { %v1450_v50 = vand.u32 4294901760, %v1449_v44 }
 0x1b2   :  { %vm2401_vm6 = vcmp.ge.f32.partialorder %v3245_v36, 2.0  ;;  %v1674_v56 = vand.u32 4294901760, %v3359_v49 }
 0x1b3   :  { %1115 = vmatmul.f32.gmra.mxu0 %v3171_v40  ;;  %1302 = vmatmul.f32.vlgmr.msrb.gmra.mxu1 %v1182_v55  ;;  %v3252_v31 = vsel %vm2401_vm6, 1.0, %v2629_v5 }
 0x1b4   :  { %2422 = vst.msk [vmem:[%s3843_s5 + $0x8] sm:$0xff] %vm2416_vm4, %v3252_v31  ;;  %1611 = vmatpush.msrb.mxu1 %v2628_v37  ;;  %v874_v40 = vpop.f32.mrf.mxu2 }
 0x1b5   :  { %1341 = vmatmul.f32.vlgmr.msra.gmra.mxu2 %v3154_v20  ;;  %v875_v1 = vadd.f32 %v874_v40, %v840_v61  ;;  %v1675_v61 = vsub.f32 %v3359_v49, %v1674_v56  ;;  %v1646_v40 = vsel %vm105_vm0, %v3187_v51, 0  ;;  %v3386_v51 = vmax.f32 %v3231_v0, 1.0 }
 0x1b6   :  { %1612 = vmatpush.msrb.mxu1 %v2628_v37  ;;  %1660 = vmatpush.msra.mxu2 %v2628_v37 }
 0x1b7   :  { %1374 = vmatmul.f32.vlgmr.msra.gmra.mxu3 %v3154_v20  ;;  %v907_v55 = vpop.f32.mrf.mxu3  ;;  %v1676_v60 = vand.u32 4294901760, %v1675_v61  ;;  %2488 = vrcp.f32 %v3386_v51  ;;  %vm2125_vm9 = vweird.f32 %v3386_v51 }
 0x1b8   :  { %v3264_v3 = vadd.f32 %v907_v55, %v875_v1  ;;  %1613 = vmatpush.msrb.mxu1 %v2628_v37  ;;  %1712 = vmatpush.msra.mxu3 %v2629_v5 }
 0x1b9   :  { %1661 = vmatpush.msra.mxu2 %v2628_v37 }
 0x1ba   :  { %vm2402_vm7 = vcmp.ge.f32.partialorder %v3264_v3, 2.0  ;;  %1614 = vmatpush.msrb.mxu1 %v2628_v37 }
 0x1bb   :  { %1264 = vmatmul.f32.vlgmr.msrb.gmra.mxu0 %v3162_v25  ;;  %1308 = vmatmul.f32.gmra.mxu1 %v1190_v52  ;;  %v3275_v20 = vsel %vm2402_vm7, 1.0, %v2629_v5 }
 0x1bc   :  { %2423 = vst.msk [vmem:[%s3843_s5 + $0x10] sm:$0xff] %vm2416_vm4, %v3275_v20  ;;  %1581 = vmatpush.msrb.mxu0 %v2629_v5  ;;  %1662 = vmatpush.msra.mxu2 %v2628_v37  ;;  %v878_v25 = vpop.f32.mrf.mxu2 }
 0x1bd   :  { %1345 = vmatmul.f32.gmra.mxu2 %v3174_v41  ;;  %v879_v9 = vadd.f32 %v878_v25, %v846_v8  ;;  %v1682_v8 = vand.u32 4294901760, %v3372_v58  ;;  %v3380_v25 = vand.u32 4294901760, %v1646_v40  ;;  %v3415_v7 = vpop.eup %2488 }
 0x1be   :  { %1663 = vmatpush.msra.mxu2 %v2628_v37  ;;  %vm2126_vm10 = vweird.f32 %v3415_v7 }
 0x1bf   :  { %1378 = vmatmul.f32.gmra.mxu3 %v3174_v41  ;;  %v911_v52 = vpop.f32.mrf.mxu3  ;;  %v1395_v41 = vsel %vm105_vm0, %v3112_v23, 0  ;;  %v3315_v23 = vand.u32 4294901760, %v1398_v13  ;;  %vm3452_vm11 = vmor %vm2125_vm9, %vm2126_vm10 }
 0x1c0   :  { %v3287_v42 = vadd.f32 %v911_v52, %v879_v9 }
 0x1c2   :  { %vm2403_vm8 = vcmp.ge.f32.partialorder %v3287_v42, 2.0 }
 0x1c3   :  { %1269 = vmatmul.f32.gmra.mxu0 %v3185_v2  ;;  %1314 = vmatmul.f32.gmra.mxu1 %v1198_v34  ;;  %v3294_v15 = vsel %vm2403_vm8, 1.0, %v2629_v5  ;;  %v3305_v2 = vand.u32 4294901760, %v1395_v41 }
 0x1c4   :  { %2424 = vst.msk [vmem:[%s3843_s5 + $0x18] sm:$0xff] %vm2416_vm4, %v3294_v15 }
 0x1c5   :  { %1349 = vmatmul.f32.gmra.mxu2 %v3191_v63  ;;  %v1423_v34 = vsub.f32 %v1395_v41, %v3305_v2 }
 0x1c7   :  { %1382 = vmatmul.f32.gmra.mxu3 %v3191_v63  ;;  %v1424_v6 = vand.u32 4294901760, %v1423_v34 }
 0x1c9   :  { %v1425_v63 = vsub.f32 %v1423_v34, %v1424_v6 }
 0x1cb   :  { %1274 = vmatmul.f32.gmra.mxu0 %v3199_v30  ;;  %1320 = vmatmul.f32.gmra.mxu1 %v1206_v11  ;;  %v1431_v30 = vsub.f32 %v1398_v13, %v3315_v23  ;;  %v1426_v53 = vand.u32 4294901760, %v1425_v63  ;;  %v3396_v13 = vsub.f32 %v1646_v40, %v3380_v25 }
 0x1cd   :  { %1353 = vmatmul.f32.gmra.mxu2 %v3206_v4 }
 0x1cf   :  { %1386 = vmatmul.f32.gmra.mxu3 %v3206_v4  ;;  %v1432_v4 = vand.u32 4294901760, %v1431_v30 }
 0x1d1   :  { %v1433_v12 = vsub.f32 %v1431_v30, %v1432_v4 }
 0x1d3   :  { %1279 = vmatmul.f32.gmra.mxu0 %v3217_v10  ;;  %1472 = vmatmul.f32.vlgmr.msra.gmra.mxu1 %v3305_v2  ;;  %v3327_v10 = vand.u32 4294901760, %v1401_v16  ;;  %v1434_v27 = vand.u32 4294901760, %v1433_v12  ;;  %v3408_v12 = vmax.f32 %v3245_v36, 1.0 }
 0x1d4   :  { %1779 = vmatpush.msra.mxu1 %v2628_v37 }
 0x1d5   :  { %1506 = vmatmul.f32.vlgmr.msrb.gmra.mxu2 %v1423_v34  ;;  %v1439_v11 = vsub.f32 %v1401_v16, %v3327_v10  ;;  %v1683_v34 = vsub.f32 %v3372_v58, %v1682_v8  ;;  %v1690_v16 = vand.u32 4294901760, %v3396_v13  ;;  %2490 = vrcp.f32 %v3408_v12 }
 0x1d6   :  { %1780 = vmatpush.msra.mxu1 %v2628_v37  ;;  %1823 = vmatpush.msrb.mxu2 %v2629_v5  ;;  %vm2140_vm13 = vweird.f32 %v3408_v12 }
 0x1d7   :  { %1544 = vmatmul.f32.vlgmr.msrb.gmra.mxu3 %v1424_v6  ;;  %v1440_v22 = vand.u32 4294901760, %v1439_v11  ;;  %v1691_v24 = vsub.f32 %v3396_v13, %v1690_v16 }
 0x1d8   :  { %1781 = vmatpush.msra.mxu1 %v2628_v37  ;;  %1853 = vmatpush.msrb.mxu3 %v2628_v37 }
 0x1d9   :  { %v1441_v32 = vsub.f32 %v1439_v11, %v1440_v22 }
 0x1da   :  { %1782 = vmatpush.msra.mxu1 %v2628_v37  ;;  %1854 = vmatpush.msrb.mxu3 %v2628_v37 }
 0x1db   :  { %1427 = vmatmul.f32.vlgmr.msra.gmra.mxu0 %v1426_v53  ;;  %1476 = vmatmul.f32.gmra.mxu1 %v3315_v23  ;;  %v1442_v33 = vand.u32 4294901760, %v1441_v32  ;;  %v3428_v21 = vpop.eup %2490 }
 0x1dc   :  { %1745 = vmatpush.msra.mxu0 %v2629_v5  ;;  %1855 = vmatpush.msrb.mxu3 %v2628_v37  ;;  %vm2141_vm14 = vweird.f32 %v3428_v21 }
 0x1dd   :  { %1511 = vmatmul.f32.gmra.mxu2 %v1431_v30  ;;  %v1684_v30 = vand.u32 4294901760, %v1683_v34  ;;  %vm3489_vm15 = vmor %vm2140_vm13, %vm2141_vm14 }
 0x1de   :  { %1856 = vmatpush.msrb.mxu3 %v2628_v37 }
 0x1df   :  { %1550 = vmatmul.f32.gmra.mxu3 %v1432_v4 }
 0x1e3   :  { %1435 = vmatmul.f32.gmra.mxu0 %v1434_v27  ;;  %1480 = vmatmul.f32.gmra.mxu1 %v3327_v10 }
 0x1e5   :  { %1516 = vmatmul.f32.gmra.mxu2 %v1439_v11 }
 0x1e7   :  { %1556 = vmatmul.f32.gmra.mxu3 %v1440_v22  ;;  %v2121_v22 = vmul.f32 %v3415_v7, %v3386_v51 }
 0x1e9   :  { %v2122_v44 = vsub.f32 1.0, %v2121_v22 }
 0x1eb   :  { %1443 = vmatmul.f32.gmra.mxu0 %v1442_v33  ;;  %1484 = vmatmul.f32.gmra.mxu1 %v3340_v35  ;;  %v3422_v33 = vmax.f32 %v3264_v3, 1.0  ;;  %v2123_v3 = vmul.f32 %v3415_v7, %v2122_v44 }
 0x1ed   :  { %1521 = vmatmul.f32.gmra.mxu2 %v1447_v18  ;;  %v1692_v18 = vand.u32 4294901760, %v1691_v24  ;;  %2492 = vrcp.f32 %v3422_v33  ;;  %vm2155_vm2 = vweird.f32 %v3422_v33 }
 0x1ef   :  { %1562 = vmatmul.f32.gmra.mxu3 %v1448_v48 }
 0x1f0   :  { %v993_v17 = vpop.f32.mrf.mxu1 }
 0x1f3   :  { %1451 = vmatmul.f32.gmra.mxu0 %v1450_v50  ;;  %1616 = vmatmul.f32.vlgmr.msrb.gmra.mxu1 %v3305_v2 }
 0x1f4   :  { %1954 = vmatpush.msrb.mxu1 %v2629_v5 }
 0x1f5   :  { %1669 = vmatmul.f32.vlgmr.msra.gmra.mxu2 %v1668_v54  ;;  %v2136_v54 = vmul.f32 %v3428_v21, %v3408_v12 }
 0x1f6   :  { %1987 = vmatpush.msra.mxu2 %v2629_v5 }
 0x1f7   :  { %1714 = vmatmul.f32.vlgmr.msra.gmra.mxu3 %v3342_v29 }
 0x1f8   :  { %v948_v1 = vpop.f32.mrf.mxu0  ;;  %v997_v55 = vpop.f32.mrf.mxu1  ;;  %2021 = vmatpush.msra.mxu3 %v2628_v37 }
 0x1f9   :  { %v994_v19 = vadd.f32 %v993_v17, %v948_v1  ;;  %v1027_v59 = vpop.f32.mrf.mxu2 }
 0x1fa   :  { %v1065_v9 = vpop.f32.mrf.mxu3  ;;  %2022 = vmatpush.msra.mxu3 %v2628_v37 }
 0x1fb   :  { %v1028_v52 = vadd.f32 %v1027_v59, %v994_v19  ;;  %1583 = vmatmul.f32.vlgmr.msrb.gmra.mxu0 %v3305_v2  ;;  %1620 = vmatmul.f32.gmra.mxu1 %v3315_v23  ;;  %v3442_v19 = vmax.f32 %v3287_v42, 1.0  ;;  %v3445_v59 = vpop.eup %2492 }
 0x1fc   :  { %1902 = vmatpush.msrb.mxu0 %v2628_v37  ;;  %2023 = vmatpush.msra.mxu3 %v2628_v37  ;;  %v2151_v42 = vmul.f32 %v3445_v59, %v3422_v33  ;;  %vm2156_vm3 = vweird.f32 %v3445_v59 }
 0x1fd   :  { %v3390_v41 = vadd.f32 %v1065_v9, %v1028_v52  ;;  %1677 = vmatmul.f32.gmra.mxu2 %v1676_v60  ;;  %v2137_v60 = vsub.f32 1.0, %v2136_v54  ;;  %2494 = vrcp.f32 %v3442_v19  ;;  %vm3519_vm5 = vmor %vm2155_vm2, %vm2156_vm3  ;;  %vm2170_vm7 = vweird.f32 %v3442_v19 }
 0x1fe   :  { %1903 = vmatpush.msrb.mxu0 %v2628_v37  ;;  %2024 = vmatpush.msra.mxu3 %v2628_v37  ;;  %v2152_v24 = vsub.f32 1.0, %v2151_v42 }
 0x1ff   :  { %1718 = vmatmul.f32.gmra.mxu3 %v3352_v39 }
 0x200   :  { %v956_v0 = vpop.f32.mrf.mxu0  ;;  %v1001_v2 = vpop.f32.mrf.mxu1  ;;  %1904 = vmatpush.msrb.mxu0 %v2628_v37 }
 0x201   :  { %v998_v6 = vadd.f32 %v997_v55, %v956_v0  ;;  %v1032_v63 = vpop.f32.mrf.mxu2  ;;  %v2131_v55 = vand.u32 2147483648, %v3386_v51 }
 0x202   :  { %v1071_v53 = vpop.f32.mrf.mxu3  ;;  %1905 = vmatpush.msrb.mxu0 %v2628_v37 }
 0x203   :  { %v1033_v4 = vadd.f32 %v1032_v63, %v998_v6  ;;  %1587 = vmatmul.f32.gmra.mxu0 %v3315_v23  ;;  %1624 = vmatmul.f32.gmra.mxu1 %v3327_v10  ;;  %v2132_v0 = vor.u32 1.1754944e-38, %v2131_v55 }
 0x205   :  { %v3410_v11 = vadd.f32 %v1071_v53, %v1033_v4  ;;  %1685 = vmatmul.f32.gmra.mxu2 %v1684_v30 }
 0x207   :  { %1722 = vmatmul.f32.gmra.mxu3 %v3364_v57 }
 0x208   :  { %v964_v27 = vpop.f32.mrf.mxu0  ;;  %v1005_v23 = vpop.f32.mrf.mxu1 }
 0x209   :  { %v1002_v36 = vadd.f32 %v1001_v2, %v964_v27  ;;  %v1037_v32 = vpop.f32.mrf.mxu2 }
 0x20a   :  { %v1077_v45 = vpop.f32.mrf.mxu3 }
 0x20b   :  { %v1038_v48 = vadd.f32 %v1037_v32, %v1002_v36  ;;  %1591 = vmatmul.f32.gmra.mxu0 %v3327_v10  ;;  %1628 = vmatmul.f32.gmra.mxu1 %v3340_v35 }
 0x20d   :  { %v3426_v46 = vadd.f32 %v1077_v45, %v1038_v48  ;;  %1693 = vmatmul.f32.gmra.mxu2 %v1692_v18 }
 0x20f   :  { %1726 = vmatmul.f32.gmra.mxu3 %v3380_v25 }
 0x210   :  { %v972_v17 = vpop.f32.mrf.mxu0  ;;  %v1137_v50 = vpop.f32.mrf.mxu1 }
 0x211   :  { %v1006_v10 = vadd.f32 %v1005_v23, %v972_v17  ;;  %v1042_v61 = vpop.f32.mrf.mxu2  ;;  %v3485_v23 = vpop.eup %2494 }
 0x212   :  { %v1083_v40 = vpop.f32.mrf.mxu3  ;;  %v2166_v18 = vmul.f32 %v3485_v23, %v3442_v19  ;;  %vm2171_vm8 = vweird.f32 %v3485_v23 }
 0x213   :  { %v1043_v1 = vadd.f32 %v1042_v61, %v1006_v10  ;;  %1595 = vmatmul.f32.gmra.mxu0 %v3340_v35  ;;  %1786 = vmatmul.f32.vlgmr.msra.gmra.mxu1 %v1666_v47  ;;  %v2124_v35 = vadd.f32 %v3415_v7, %v2123_v3  ;;  %v2129_v47 = vand.u32 2147483647, %v3386_v51  ;;  %v2138_v51 = vmul.f32 %v3428_v21, %v2137_v60  ;;  %vm3550_vm9 = vmor %vm2170_vm7, %vm2171_vm8 }
 0x214   :  { %2095 = vmatpush.msra.mxu1 %v2628_v37  ;;  %v2167_v3 = vsub.f32 1.0, %v2166_v18  ;;  %v2159_v10 = vand.u32 2147483647, %v3422_v33 }
 0x215   :  { %v3447_v9 = vadd.f32 %v1083_v40, %v1043_v1  ;;  %1825 = vmatmul.f32.vlgmr.msrb.gmra.mxu2 %v3342_v29  ;;  %v2128_v63 = vsel %vm3452_vm11, %v3415_v7, %v2124_v35  ;;  %vm2130_vm12 = vcmp.eq.f32.partialorder %v2129_v47, 8.507059e+37  ;;  %v2139_v27 = vadd.f32 %v3428_v21, %v2138_v51 }
 0x216   :  { %2096 = vmatpush.msra.mxu1 %v2628_v37  ;;  %v3476_v7 = vsel %vm2130_vm12, %v2132_v0, %v2128_v63  ;;  %v2168_v55 = vmul.f32 %v3485_v23, %v2167_v3  ;;  %vm2160_vm6 = vcmp.eq.f32.partialorder %v2159_v10, 8.507059e+37 }
 0x217   :  { %1858 = vmatmul.f32.vlgmr.msrb.gmra.mxu3 %v3342_v29 }
 0x218   :  { %v1104_v34 = vpop.f32.mrf.mxu0  ;;  %v1141_v2 = vpop.f32.mrf.mxu1  ;;  %2097 = vmatpush.msra.mxu1 %v2628_v37  ;;  %v2169_v0 = vadd.f32 %v3485_v23, %v2168_v55 }
 0x219   :  { %v1105_v6 = vadd.f32 %v1104_v34, %v3390_v41  ;;  %v1186_v29 = vpop.f32.mrf.mxu2  ;;  %v2146_v41 = vand.u32 2147483648, %v3408_v12 }
 0x21a   :  { %v1231_v30 = vpop.f32.mrf.mxu3  ;;  %2098 = vmatpush.msra.mxu1 %v2628_v37 }
 0x21b   :  { %v1138_v53 = vadd.f32 %v1137_v50, %v1105_v6  ;;  %v3469_v4 = vadd.f32 %v1231_v30, %v1186_v29  ;;  %1748 = vmatmul.f32.vlgmr.msra.gmra.mxu0 %v3347_v38  ;;  %1792 = vmatmul.f32.gmra.mxu1 %v1674_v56  ;;  %v2144_v38 = vand.u32 2147483647, %v3408_v12  ;;  %v2147_v36 = vor.u32 1.1754944e-38, %v2146_v41 }
 0x21c   :  { %2065 = vmatpush.msra.mxu0 %v2629_v5  ;;  %v2153_v5 = vmul.f32 %v3445_v59, %v2152_v24  ;;  %v2143_v12 = vsel %vm3489_vm15, %v3428_v21, %v2139_v27  ;;  %v1879_v21 = vsel %vm105_vm0, %v3114_v28, 0  ;;  %v1885_v56 = vsel %vm105_vm0, %v3156_v14, 0 }
 0x21d   :  { %v3480_v37 = vmul.f32 %v3476_v7, %v1138_v53  ;;  %1829 = vmatmul.f32.gmra.mxu2 %v3352_v39  ;;  %vm2145_vm1 = vcmp.eq.f32.partialorder %v2144_v38, 8.507059e+37  ;;  %v3524_v28 = vand.u32 4294901760, %v1879_v21 }
 0x21e   :  { %v3509_v50 = vsel %vm2145_vm1, %v2147_v36, %v2143_v12 }
 0x21f   :  { %1862 = vmatmul.f32.gmra.mxu3 %v3352_v39 }
 0x220   :  { %v1108_v22 = vpop.f32.mrf.mxu0  ;;  %v1145_v32 = vpop.f32.mrf.mxu1 }
 0x221   :  { %v1109_v45 = vadd.f32 %v1108_v22, %v3410_v11  ;;  %v1194_v48 = vpop.f32.mrf.mxu2  ;;  %v2161_v11 = vand.u32 2147483648, %v3422_v33 }
 0x222   :  { %v1235_v44 = vpop.f32.mrf.mxu3 }
 0x223   :  { %v1142_v39 = vadd.f32 %v1141_v2, %v1109_v45  ;;  %v3502_v17 = vadd.f32 %v1235_v44, %v1194_v48  ;;  %1753 = vmatmul.f32.gmra.mxu0 %v3359_v49  ;;  %1798 = vmatmul.f32.gmra.mxu1 %v1682_v8  ;;  %v2154_v49 = vadd.f32 %v3445_v59, %v2153_v5  ;;  %v2162_v40 = vor.u32 1.1754944e-38, %v2161_v11 }
 0x224   :  { %v3574_v45 = vand.u32 4294901760, %v1885_v56  ;;  %v1888_v11 = vsel %vm105_vm0, %v3176_v43, 0 }
 0x225   :  { %v3514_v54 = vmul.f32 %v3509_v50, %v1142_v39  ;;  %1833 = vmatmul.f32.gmra.mxu2 %v3364_v57  ;;  %v2158_v35 = vsel %vm3519_vm5, %v3445_v59, %v2154_v49  ;;  %v1907_v59 = vsub.f32 %v1879_v21, %v3524_v28 }
 0x226   :  { %v3539_v42 = vsel %vm2160_vm6, %v2162_v40, %v2158_v35  ;;  %v1923_v14 = vsub.f32 %v1885_v56, %v3574_v45 }
 0x227   :  { %1866 = vmatmul.f32.gmra.mxu3 %v3364_v57 }
 0x228   :  { %v1112_v61 = vpop.f32.mrf.mxu0  ;;  %v1149_v1 = vpop.f32.mrf.mxu1  ;;  %v1924_v40 = vand.u32 4294901760, %v1923_v14 }
 0x229   :  { %v1113_v60 = vadd.f32 %v1112_v61, %v3426_v46  ;;  %v1202_v33 = vpop.f32.mrf.mxu2  ;;  %v2176_v46 = vand.u32 2147483648, %v3442_v19 }
 0x22a   :  { %v1239_v47 = vpop.f32.mrf.mxu3 }
 0x22b   :  { %v1146_v52 = vadd.f32 %v1145_v32, %v1113_v60  ;;  %v3532_v57 = vadd.f32 %v1239_v47, %v1202_v33  ;;  %1758 = vmatmul.f32.gmra.mxu0 %v3372_v58  ;;  %1804 = vmatmul.f32.gmra.mxu1 %v1690_v16  ;;  %v2174_v58 = vand.u32 2147483647, %v3442_v19  ;;  %v1882_v16 = vsel %vm105_vm0, %v3137_v62, 0 }
 0x22c   :  { %v2177_v6 = vor.u32 1.1754944e-38, %v2176_v46  ;;  %v3555_v29 = vand.u32 4294901760, %v1882_v16  ;;  %v2173_v19 = vsel %vm3550_vm9, %v3485_v23, %v2169_v0  ;;  %v1908_v62 = vand.u32 4294901760, %v1907_v59 }
 0x22d   :  { %v3543_v34 = vmul.f32 %v3539_v42, %v1146_v52  ;;  %1837 = vmatmul.f32.gmra.mxu2 %v3380_v25  ;;  %vm2175_vm10 = vcmp.eq.f32.partialorder %v2174_v58, 8.507059e+37  ;;  %v1925_v33 = vsub.f32 %v1923_v14, %v1924_v40 }
 0x22e   :  { %v1915_v38 = vsub.f32 %v1882_v16, %v3555_v29  ;;  %v1909_v23 = vsub.f32 %v1907_v59, %v1908_v62 }
 0x22f   :  { %1870 = vmatmul.f32.gmra.mxu3 %v3380_v25  ;;  %v3565_v25 = vsel %vm2175_vm10, %v2177_v6, %v2173_v19  ;;  %v1926_v16 = vand.u32 4294901760, %v1925_v33 }
 0x230   :  { %v1116_v51 = vpop.f32.mrf.mxu0  ;;  %v1303_v63 = vpop.f32.mrf.mxu1  ;;  %v1916_v36 = vand.u32 4294901760, %v1915_v38  ;;  %v1910_v18 = vand.u32 4294901760, %v1909_v23 }
 0x231   :  { %v1117_v30 = vadd.f32 %v1116_v51, %v3447_v9  ;;  %v1210_v53 = vpop.f32.mrf.mxu2 }
 0x232   :  { %v1243_v41 = vpop.f32.mrf.mxu3  ;;  %v1917_v44 = vsub.f32 %v1915_v38, %v1916_v36 }
 0x233   :  { %v1150_v24 = vadd.f32 %v1149_v1, %v1117_v30  ;;  %v3561_v27 = vadd.f32 %v1243_v41, %v1210_v53  ;;  %1763 = vmatmul.f32.gmra.mxu0 %v3396_v13  ;;  %1956 = vmatmul.f32.vlgmr.msrb.gmra.mxu1 %v3524_v28  ;;  %v3584_v1 = vand.u32 4294901760, %v1888_v11 }
 0x234   :  { %v1918_v49 = vand.u32 4294901760, %v1917_v44 }
 0x235   :  { %v3569_v9 = vmul.f32 %v3565_v25, %v1150_v24  ;;  %1990 = vmatmul.f32.vlgmr.msra.gmra.mxu2 %v1907_v59  ;;  %v1931_v47 = vsub.f32 %v1888_v11, %v3584_v1 }
 0x237   :  { %2028 = vmatmul.f32.vlgmr.msra.gmra.mxu3 %v1908_v62  ;;  %v1932_v2 = vand.u32 4294901760, %v1931_v47 }
 0x238   :  { %v1265_v5 = vpop.f32.mrf.mxu0  ;;  %v1309_v22 = vpop.f32.mrf.mxu1 }
 0x239   :  { %v1266_v13 = vadd.f32 %v1265_v5, %v3469_v4  ;;  %v1342_v32 = vpop.f32.mrf.mxu2  ;;  %v1933_v19 = vsub.f32 %v1931_v47, %v1932_v2 }
 0x23a   :  { %v1375_v12 = vpop.f32.mrf.mxu3 }
 0x23b   :  { %v1304_v48 = vadd.f32 %v1303_v63, %v1266_v13  ;;  %1911 = vmatmul.f32.vlgmr.msrb.gmra.mxu0 %v1910_v18  ;;  %1960 = vmatmul.f32.gmra.mxu1 %v3555_v29  ;;  %v1934_v23 = vand.u32 4294901760, %v1933_v19 }
 0x23d   :  { %v1343_v39 = vadd.f32 %v1342_v32, %v1304_v48  ;;  %1995 = vmatmul.f32.gmra.mxu2 %v1915_v38 }
 0x23f   :  { %v1376_v21 = vadd.f32 %v1375_v12, %v1343_v39  ;;  %2034 = vmatmul.f32.gmra.mxu3 %v1916_v36 }
 0x240   :  { %v1270_v4 = vpop.f32.mrf.mxu0  ;;  %v1315_v3 = vpop.f32.mrf.mxu1 }
 0x241   :  { %v3581_v10 = vmul.f32 %v3476_v7, %v1376_v21  ;;  %v1271_v8 = vadd.f32 %v1270_v4, %v3502_v17  ;;  %v1346_v61 = vpop.f32.mrf.mxu2 }
 0x242   :  { %v1379_v55 = vpop.f32.mrf.mxu3 }
 0x243   :  { %v3588_v60 = vmul.f32 %v3581_v10, %v3480_v37  ;;  %v1310_v43 = vadd.f32 %v1309_v22, %v1271_v8  ;;  %1919 = vmatmul.f32.gmra.mxu0 %v1918_v49  ;;  %1964 = vmatmul.f32.gmra.mxu1 %v3574_v45 }
 0x245   :  { %v1347_v35 = vadd.f32 %v1346_v61, %v1310_v43  ;;  %2000 = vmatmul.f32.gmra.mxu2 %v1923_v14 }
 0x247   :  { %v1380_v52 = vadd.f32 %v1379_v55, %v1347_v35  ;;  %2040 = vmatmul.f32.gmra.mxu3 %v1924_v40 }
 0x248   :  { %v1275_v17 = vpop.f32.mrf.mxu0  ;;  %v1321_v46 = vpop.f32.mrf.mxu1 }
 0x249   :  { %v3593_v59 = vmul.f32 %v3509_v50, %v1380_v52  ;;  %v1276_v0 = vadd.f32 %v1275_v17, %v3532_v57  ;;  %v1350_v58 = vpop.f32.mrf.mxu2 }
 0x24a   :  { %v1383_v51 = vpop.f32.mrf.mxu3 }
 0x24b   :  { %v3598_v6 = vmul.f32 %v3593_v59, %v3514_v54  ;;  %v1316_v63 = vadd.f32 %v1315_v3, %v1276_v0  ;;  %1927 = vmatmul.f32.gmra.mxu0 %v1926_v16  ;;  %1968 = vmatmul.f32.gmra.mxu1 %v3584_v1 }
 0x24d   :  { %v1351_v30 = vadd.f32 %v1350_v58, %v1316_v63  ;;  %2005 = vmatmul.f32.gmra.mxu2 %v1931_v47 }
 0x24f   :  { %v1384_v53 = vadd.f32 %v1383_v51, %v1351_v30  ;;  %2046 = vmatmul.f32.gmra.mxu3 %v1932_v2 }
 0x250   :  { %v1280_v62 = vpop.f32.mrf.mxu0  ;;  %v1473_v41 = vpop.f32.mrf.mxu1 }
 0x251   :  { %v3602_v57 = vmul.f32 %v3539_v42, %v1384_v53  ;;  %v1281_v24 = vadd.f32 %v1280_v62, %v3561_v27  ;;  %v1354_v38 = vpop.f32.mrf.mxu2 }
 0x252   :  { %v1387_v56 = vpop.f32.mrf.mxu3 }
 0x253   :  { %v3607_v5 = vmul.f32 %v3602_v57, %v3543_v34  ;;  %v1322_v22 = vadd.f32 %v1321_v46, %v1281_v24  ;;  %1935 = vmatmul.f32.gmra.mxu0 %v1934_v23  ;;  %2100 = vmatmul.f32.vlgmr.msra.gmra.mxu1 %v3524_v28 }
 0x255   :  { %v1355_v36 = vadd.f32 %v1354_v38, %v1322_v22 }
 0x257   :  { %v1388_v13 = vadd.f32 %v1387_v56, %v1355_v36  ;;  %v2205_v56 = vmul.f32 %v3514_v54, %v3514_v54 }
 0x258   :  { %v1428_v32 = vpop.f32.mrf.mxu0  ;;  %v1477_v18 = vpop.f32.mrf.mxu1 }
 0x259   :  { %v3611_v12 = vmul.f32 %v3565_v25, %v1388_v13  ;;  %v1474_v48 = vadd.f32 %v1473_v41, %v1428_v32  ;;  %v1507_v27 = vpop.f32.mrf.mxu2 }
 0x25a   :  { %v1545_v44 = vpop.f32.mrf.mxu3 }
 0x25b   :  { %v3615_v39 = vmul.f32 %v3611_v12, %v3569_v9  ;;  %2067 = vmatmul.f32.vlgmr.msra.gmra.mxu0 %v3524_v28  ;;  %2104 = vmatmul.f32.gmra.mxu1 %v3555_v29  ;;  %v1508_v52 = vadd.f32 %v1507_v27, %v1474_v48 }
 0x260   :  { %v1436_v14 = vpop.f32.mrf.mxu0  ;;  %v1481_v11 = vpop.f32.mrf.mxu1 }
 0x261   :  { %v1478_v21 = vadd.f32 %v1477_v18, %v1436_v14  ;;  %v1512_v4 = vpop.f32.mrf.mxu2 }
 0x262   :  { %v1551_v3 = vpop.f32.mrf.mxu3 }
 0x263   :  { %2071 = vmatmul.f32.gmra.mxu0 %v3555_v29  ;;  %2108 = vmatmul.f32.gmra.mxu1 %v3574_v45  ;;  %v1546_v29 = vadd.f32 %v1545_v44, %v1508_v52  ;;  %v1513_v2 = vadd.f32 %v1512_v4, %v1478_v21 }
 0x265   :  { %v1552_v30 = vadd.f32 %v1551_v3, %v1513_v2 }
 0x268   :  { %v1444_v49 = vpop.f32.mrf.mxu0  ;;  %v1485_v8 = vpop.f32.mrf.mxu1 }
 0x269   :  { %v1482_v61 = vadd.f32 %v1481_v11, %v1444_v49  ;;  %v1517_v40 = vpop.f32.mrf.mxu2  ;;  %v2206_v11 = vmul.f32 %v3543_v34, %v3543_v34 }
 0x26a   :  { %v1557_v55 = vpop.f32.mrf.mxu3 }
 0x26b   :  { %2075 = vmatmul.f32.gmra.mxu0 %v3574_v45  ;;  %2112 = vmatmul.f32.gmra.mxu1 %v3584_v1  ;;  %v2204_v45 = vmul.f32 %v3480_v37, %v3480_v37  ;;  %v1518_v38 = vadd.f32 %v1517_v40, %v1482_v61 }
 0x26d   :  { %v1558_v36 = vadd.f32 %v1557_v55, %v1518_v38 }
 0x270   :  { %v1452_v28 = vpop.f32.mrf.mxu0  ;;  %v1617_v43 = vpop.f32.mrf.mxu1 }
 0x271   :  { %v1486_v35 = vadd.f32 %v1485_v8, %v1452_v28  ;;  %v1522_v33 = vpop.f32.mrf.mxu2 }
 0x272   :  { %v1563_v47 = vpop.f32.mrf.mxu3 }
 0x273   :  { %2079 = vmatmul.f32.gmra.mxu0 %v3584_v1  ;;  %v1523_v44 = vadd.f32 %v1522_v33, %v1486_v35 }
 0x275   :  { %v1564_v4 = vadd.f32 %v1563_v47, %v1523_v44 }
 0x278   :  { %v1584_v17 = vpop.f32.mrf.mxu0  ;;  %v1621_v46 = vpop.f32.mrf.mxu1 }
 0x279   :  { %v1585_v0 = vadd.f32 %v1584_v17, %v1546_v29  ;;  %v1670_v58 = vpop.f32.mrf.mxu2 }
 0x27a   :  { %v1715_v16 = vpop.f32.mrf.mxu3 }
 0x27b   :  { %v1618_v51 = vadd.f32 %v1617_v43, %v1585_v0  ;;  %v2207_v43 = vmul.f32 %v3569_v9, %v3569_v9  ;;  %v1716_v34 = vadd.f32 %v1715_v16, %v1670_v58  ;;  %v2220_v58 = vmul.f32 %v3581_v10, %v3581_v10 }
 0x27d   :  { %v2200_v63 = vmul.f32 %v3476_v7, %v1618_v51 }
 0x27f   :  { %v2208_v19 = vsub.f32 %v2200_v63, %v2204_v45 }
 0x280   :  { %v1588_v53 = vpop.f32.mrf.mxu0  ;;  %v1625_v62 = vpop.f32.mrf.mxu1 }
 0x281   :  { %v1589_v41 = vadd.f32 %v1588_v53, %v1552_v30  ;;  %v1678_v24 = vpop.f32.mrf.mxu2  ;;  %v3633_v40 = vmax.f32 %v2208_v19, 0.0 }
 0x282   :  { %v1719_v1 = vpop.f32.mrf.mxu3 }
 0x283   :  { %v1622_v23 = vadd.f32 %v1621_v46, %v1589_v41  ;;  %2496 = vrsqrt.f32 %v3633_v40  ;;  %v1720_v9 = vadd.f32 %v1719_v1, %v1678_v24  ;;  %vm2243_vm0 = vcmp.eq.f32.partialorder %v3633_v40, inf }
 0x284   :  { %vm2245_vm12 = vcmp.eq.f32.partialorder %v3633_v40, 0.0 }
 0x285   :  { %v2201_v22 = vmul.f32 %v3509_v50, %v1622_v23 }
 0x287   :  { %v2209_v13 = vsub.f32 %v2201_v22, %v2205_v56 }
 0x288   :  { %v1592_v32 = vpop.f32.mrf.mxu0  ;;  %v1629_v37 = vpop.f32.mrf.mxu1 }
 0x289   :  { %v1593_v18 = vadd.f32 %v1592_v32, %v1558_v36  ;;  %v1686_v48 = vpop.f32.mrf.mxu2  ;;  %v3639_v0 = vmax.f32 %v2209_v13, 0.0  ;;  %v2497_v51 = vpop.eup %2496 }
 0x28a   :  { %v1723_v27 = vpop.f32.mrf.mxu3  ;;  %v2237_v63 = vmul.f32 %v2497_v51, %v3633_v40 }
 0x28b   :  { %v1626_v14 = vadd.f32 %v1625_v62, %v1593_v18  ;;  %2498 = vrsqrt.f32 %v3639_v0  ;;  %vm2255_vm14 = vcmp.eq.f32.partialorder %v3639_v0, inf  ;;  %vm2257_vm15 = vcmp.eq.f32.partialorder %v3639_v0, 0.0 }
 0x28c   :  { %v2238_v23 = vmul.f32 %v2497_v51, %v2237_v63  ;;  %v2222_v63 = vmul.f32 %v3602_v57, %v3602_v57 }
 0x28d   :  { %v2202_v21 = vmul.f32 %v3539_v42, %v1626_v14 }
 0x28e   :  { %v2239_v1 = vmul.f32 0.5, %v2238_v23 }
 0x28f   :  { %v2210_v3 = vsub.f32 %v2202_v21, %v2206_v11  ;;  %v2221_v11 = vmul.f32 %v3593_v59, %v3593_v59 }
 0x290   :  { %v1596_v49 = vpop.f32.mrf.mxu0  ;;  %v1787_v54 = vpop.f32.mrf.mxu1 }
 0x291   :  { %v1597_v8 = vadd.f32 %v1596_v49, %v1564_v4  ;;  %v1694_v61 = vpop.f32.mrf.mxu2  ;;  %v3646_v36 = vmax.f32 %v2210_v3, 0.0  ;;  %v2499_v13 = vpop.eup %2498 }
 0x292   :  { %v1727_v55 = vpop.f32.mrf.mxu3  ;;  %v2249_v10 = vmul.f32 %v2499_v13, %v3639_v0 }
 0x293   :  { %v1630_v28 = vadd.f32 %v1629_v37, %v1597_v8  ;;  %v1724_v37 = vadd.f32 %v1723_v27, %v1686_v48  ;;  %vm2267_vm3 = vcmp.eq.f32.partialorder %v3646_v36, inf  ;;  %vm2269_vm6 = vcmp.eq.f32.partialorder %v3646_v36, 0.0 }
 0x294   :  { %v2250_v8 = vmul.f32 %v2499_v13, %v2249_v10 }
 0x295   :  { %v2203_v35 = vmul.f32 %v3565_v25, %v1630_v28 }
 0x297   :  { %v2211_v33 = vsub.f32 %v2203_v35, %v2207_v43 }
 0x298   :  { %v1749_v52 = vpop.f32.mrf.mxu0  ;;  %v1793_v47 = vpop.f32.mrf.mxu1 }
 0x299   :  { %v1750_v29 = vadd.f32 %v1749_v52, %v1716_v34  ;;  %v1826_v17 = vpop.f32.mrf.mxu2  ;;  %v3656_v3 = vmax.f32 %v2211_v33, 0.0 }
 0x29a   :  { %v1859_v46 = vpop.f32.mrf.mxu3 }
 0x29b   :  { %v1788_v2 = vadd.f32 %v1787_v54, %v1750_v29  ;;  %v2240_v54 = vsub.f32 1.5, %v2239_v1  ;;  %v1728_v29 = vadd.f32 %v1727_v55, %v1694_v61  ;;  %vm2279_vm8 = vcmp.eq.f32.partialorder %v3656_v3, inf }
 0x29c   :  { %vm2281_vm10 = vcmp.eq.f32.partialorder %v3656_v3, 0.0 }
 0x29d   :  { %v1827_v45 = vadd.f32 %v1826_v17, %v1788_v2  ;;  %v2251_v17 = vmul.f32 0.5, %v2250_v8 }
 0x29f   :  { %v1860_v30 = vadd.f32 %v1859_v46, %v1827_v45 }
 0x2a0   :  { %v1754_v19 = vpop.f32.mrf.mxu0  ;;  %v1799_v53 = vpop.f32.mrf.mxu1 }
 0x2a1   :  { %v2216_v16 = vmul.f32 %v3476_v7, %v1860_v30  ;;  %v1755_v62 = vadd.f32 %v1754_v19, %v1720_v9  ;;  %v1830_v41 = vpop.f32.mrf.mxu2 }
 0x2a2   :  { %v1863_v38 = vpop.f32.mrf.mxu3 }
 0x2a3   :  { %v2224_v56 = vsub.f32 %v2216_v16, %v2220_v58  ;;  %v1794_v22 = vadd.f32 %v1793_v47, %v1755_v62  ;;  %v2241_v47 = vmul.f32 %v2497_v51, %v2240_v54  ;;  %v2252_v16 = vsub.f32 1.5, %v2251_v17 }
 0x2a5   :  { %v3648_v32 = vmax.f32 %v2224_v56, 0.0  ;;  %v1831_v24 = vadd.f32 %v1830_v41, %v1794_v22  ;;  %v2242_v61 = vmul.f32 %v2241_v47, %v3633_v40  ;;  %v2223_v22 = vmul.f32 %v3611_v12, %v3611_v12 }
 0x2a7   :  { %2500 = vrsqrt.f32 %v3648_v32  ;;  %v1864_v18 = vadd.f32 %v1863_v38, %v1831_v24  ;;  %v2244_v10 = vsel %vm2243_vm0, %v3633_v40, %v2242_v61  ;;  %vm2291_vm11 = vcmp.eq.f32.partialorder %v3648_v32, inf }
 0x2a8   :  { %2502 = vrsqrt.f32 %v3646_v36  ;;  %v1759_v44 = vpop.f32.mrf.mxu0  ;;  %v1805_v14 = vpop.f32.mrf.mxu1  ;;  %vm2293_vm13 = vcmp.eq.f32.partialorder %v3648_v32, 0.0 }
 0x2a9   :  { %v2217_v21 = vmul.f32 %v3509_v50, %v1864_v18  ;;  %v1760_v4 = vadd.f32 %v1759_v44, %v1724_v37  ;;  %v1834_v49 = vpop.f32.mrf.mxu2  ;;  %2504 = vrsqrt.f32 %v3656_v3  ;;  %v2246_v44 = vand.u32 2147483648, %v3633_v40 }
 0x2aa   :  { %v1867_v28 = vpop.f32.mrf.mxu3 }
 0x2ab   :  { %v2225_v48 = vsub.f32 %v2217_v21, %v2221_v11  ;;  %v1800_v27 = vadd.f32 %v1799_v53, %v1760_v4 }
 0x2ad   :  { %v2501_v43 = vpop.eup %2500  ;;  %v3658_v35 = vmax.f32 %v2225_v48, 0.0  ;;  %v1835_v34 = vadd.f32 %v1834_v49, %v1800_v27  ;;  %v2294_v48 = vand.u32 2147483648, %v3648_v32 }
 0x2ae   :  { %v3660_v52 = vpop.eup %2502  ;;  %v2285_v59 = vmul.f32 %v2501_v43, %v3648_v32 }
 0x2af   :  { %2506 = vrsqrt.f32 %v3658_v35  ;;  %v1868_v33 = vadd.f32 %v1867_v28, %v1835_v34  ;;  %v2261_v9 = vmul.f32 %v3660_v52, %v3646_v36  ;;  %v3673_v58 = vpop.eup %2504  ;;  %vm2303_vm1 = vcmp.eq.f32.partialorder %v3658_v35, inf }
 0x2b0   :  { %v2286_v46 = vmul.f32 %v2501_v43, %v2285_v59  ;;  %v1764_v2 = vpop.f32.mrf.mxu0  ;;  %v3665_v45 = vpop.f32.mrf.mxu1  ;;  %v2273_v11 = vmul.f32 %v3673_v58, %v3656_v3  ;;  %vm2305_vm2 = vcmp.eq.f32.partialorder %v3658_v35, 0.0 }
 0x2b1   :  { %v2218_v30 = vmul.f32 %v3539_v42, %v1868_v33  ;;  %v1765_v19 = vadd.f32 %v1764_v2, %v1728_v29  ;;  %v1838_v41 = vpop.f32.mrf.mxu2  ;;  %v2262_v23 = vmul.f32 %v3660_v52, %v2261_v9 }
 0x2b2   :  { %v2287_v53 = vmul.f32 0.5, %v2286_v46  ;;  %v1871_v37 = vpop.f32.mrf.mxu3  ;;  %v2274_v47 = vmul.f32 %v3673_v58, %v2273_v11 }
 0x2b3   :  { %v2226_v55 = vsub.f32 %v2218_v30, %v2222_v63  ;;  %v1806_v51 = vadd.f32 %v1805_v14, %v1765_v19  ;;  %v2253_v14 = vmul.f32 %v2499_v13, %v2252_v16  ;;  %v2263_v54 = vmul.f32 0.5, %v2262_v23 }
 0x2b4   :  { %v2288_v62 = vsub.f32 1.5, %v2287_v53  ;;  %v2258_v16 = vand.u32 2147483648, %v3639_v0 }
 0x2b5   :  { %v2507_v38 = vpop.eup %2506  ;;  %v3676_v57 = vmax.f32 %v2226_v55, 0.0  ;;  %v1839_v56 = vadd.f32 %v1838_v41, %v1806_v51  ;;  %v2254_v59 = vmul.f32 %v2253_v14, %v3639_v0  ;;  %v2264_v46 = vsub.f32 1.5, %v2263_v54 }
 0x2b6   :  { %v2289_v24 = vmul.f32 %v2501_v43, %v2288_v62  ;;  %v2297_v1 = vmul.f32 %v2507_v38, %v3658_v35  ;;  %v2247_v43 = vsel %vm2245_vm12, %v2246_v44, %v2244_v10  ;;  %v2306_v51 = vand.u32 2147483648, %v3658_v35 }
 0x2b7   :  { %2508 = vrsqrt.f32 %v3676_v57  ;;  %v1872_v18 = vadd.f32 %v1871_v37, %v1839_v56  ;;  %v2256_v61 = vsel %vm2255_vm14, %v3639_v0, %v2254_v59  ;;  %v2265_v55 = vmul.f32 %v3660_v52, %v2264_v46 }
 0x2b8   :  { %v2290_v21 = vmul.f32 %v2289_v24, %v3648_v32  ;;  %v2298_v12 = vmul.f32 %v2507_v38, %v2297_v1  ;;  %v3688_v4 = vpop.f32.mrf.mxu0  ;;  %v3690_v49 = vpop.f32.mrf.mxu1  ;;  %v2259_v23 = vsel %vm2257_vm15, %v2258_v16, %v2256_v61  ;;  %vm2315_vm5 = vcmp.eq.f32.partialorder %v3676_v57, inf }
 0x2b9   :  { %v2219_v27 = vmul.f32 %v3565_v25, %v1872_v18  ;;  %v2266_v52 = vmul.f32 %v2265_v55, %v3646_v36  ;;  %vm2317_vm7 = vcmp.eq.f32.partialorder %v3676_v57, 0.0 }
 0x2ba   :  { %v2299_v8 = vmul.f32 0.5, %v2298_v12  ;;  %v2292_v13 = vsel %vm2291_vm11, %v3648_v32, %v2290_v21  ;;  %v2275_v32 = vmul.f32 0.5, %v2274_v47  ;;  %v2270_v21 = vand.u32 2147483648, %v3646_v36 }
 0x2bb   :  { %v2227_v28 = vsub.f32 %v2219_v27, %v2223_v22  ;;  %v2295_v34 = vsel %vm2293_vm13, %v2294_v48, %v2292_v13  ;;  %v2318_v12 = vand.u32 2147483648, %v3676_v57 }
 0x2bc   :  { %v2300_v29 = vsub.f32 1.5, %v2299_v8  ;;  %v2332_v33 = vmul.f32 %v2295_v34, %v2247_v43  ;;  %v2276_v22 = vsub.f32 1.5, %v2275_v32  ;;  %v1991_v8 = vpop.f32.mrf.mxu2  ;;  %v2282_v32 = vand.u32 2147483648, %v3656_v3 }
 0x2bd   :  { %v2509_v17 = vpop.eup %2508  ;;  %v3700_v2 = vmax.f32 %v2227_v28, 0.0 }
 0x2be   :  { %v2301_v63 = vmul.f32 %v2507_v38, %v2300_v29  ;;  %v2309_v40 = vmul.f32 %v2509_v17, %v3676_v57  ;;  %v3716_v41 = vadd.f32 1e-08, %v2332_v33  ;;  %v2277_v0 = vmul.f32 %v3673_v58, %v2276_v22 }
 0x2bf   :  { %2510 = vrsqrt.f32 %v3700_v2  ;;  %v1958_v33 = vadd.f32 %v3665_v45, %v3688_v4  ;;  %vm2327_vm9 = vcmp.eq.f32.partialorder %v3700_v2, inf  ;;  %vm2329_vm0 = vcmp.eq.f32.partialorder %v3700_v2, 0.0 }
 0x2c0   :  { %v2302_v9 = vmul.f32 %v2301_v63, %v3658_v35  ;;  %v2310_v30 = vmul.f32 %v2509_v17, %v2309_v40  ;;  %v3707_v19 = vpop.f32.mrf.mxu0  ;;  %v3709_v53 = vpop.f32.mrf.mxu1  ;;  %2512 = vrcp.f32 %v3716_v41  ;;  %v2278_v28 = vmul.f32 %v2277_v0, %v3656_v3 }
 0x2c1   :  { %v2330_v40 = vand.u32 2147483648, %v3700_v2  ;;  %v1992_v4 = vadd.f32 %v1991_v8, %v1958_v33  ;;  %v2351_v0 = vand.u32 2147483648, %v3716_v41  ;;  %vm2345_vm12 = vweird.f32 %v3716_v41 }
 0x2c2   :  { %v2311_v62 = vmul.f32 0.5, %v2310_v30  ;;  %v2304_v38 = vsel %vm2303_vm1, %v3658_v35, %v2302_v9  ;;  %v2268_v35 = vsel %vm2267_vm3, %v3646_v36, %v2266_v52  ;;  %v2280_v63 = vsel %vm2279_vm8, %v3656_v3, %v2278_v28 }
 0x2c3   :  { %v2307_v56 = vsel %vm2305_vm2, %v2306_v51, %v2304_v38  ;;  %v2271_v34 = vsel %vm2269_vm6, %v2270_v21, %v2268_v35  ;;  %v2283_v61 = vsel %vm2281_vm10, %v2282_v32, %v2280_v63 }
 0x2c4   :  { %v2312_v24 = vsub.f32 1.5, %v2311_v62  ;;  %v2333_v1 = vmul.f32 %v2307_v56, %v2259_v23  ;;  %v1996_v38 = vpop.f32.mrf.mxu2  ;;  %v1962_v23 = vadd.f32 %v3690_v49, %v3707_v19 }
 0x2c5   :  { %v2511_v37 = vpop.eup %2510 }
 0x2c6   :  { %v2313_v18 = vmul.f32 %v2509_v17, %v2312_v24  ;;  %v2321_v10 = vmul.f32 %v2511_v37, %v3700_v2  ;;  %v3734_v27 = vadd.f32 1e-08, %v2333_v1  ;;  %v3739_v13 = vpop.eup %2512  ;;  %v1997_v1 = vadd.f32 %v1996_v38, %v1962_v23 }
 0x2c7   :  { %v2341_v17 = vmul.f32 %v3739_v13, %v3716_v41  ;;  %vm2346_vm11 = vweird.f32 %v3739_v13 }
 0x2c8   :  { %v2314_v44 = vmul.f32 %v2313_v18, %v3676_v57  ;;  %v2322_v14 = vmul.f32 %v2511_v37, %v2321_v10  ;;  %v3725_v11 = vpop.f32.mrf.mxu0  ;;  %v3732_v48 = vpop.f32.mrf.mxu1  ;;  %2514 = vrcp.f32 %v3734_v27  ;;  %vm2347_vm13 = vmor %vm2345_vm12, %vm2346_vm11  ;;  %vm2360_vm1 = vweird.f32 %v3734_v27 }
 0x2c9   :  { %v2342_v30 = vsub.f32 1.0, %v2341_v17  ;;  %v1966_v21 = vadd.f32 %v3709_v53, %v3725_v11 }
 0x2ca   :  { %v2323_v54 = vmul.f32 0.5, %v2322_v14  ;;  %v2316_v58 = vsel %vm2315_vm5, %v3676_v57, %v2314_v44  ;;  %v2029_v57 = vpop.f32.mrf.mxu3  ;;  %v2349_v14 = vand.u32 2147483647, %v3716_v41 }
 0x2cb   :  { %v2319_v59 = vsel %vm2317_vm7, %v2318_v12, %v2316_v58  ;;  %v2030_v56 = vadd.f32 %v2029_v57, %v1992_v4  ;;  %v2343_v3 = vmul.f32 %v3739_v13, %v2342_v30 }
 0x2cc   :  { %v2324_v43 = vsub.f32 1.5, %v2323_v54  ;;  %v2334_v47 = vmul.f32 %v2319_v59, %v2271_v34  ;;  %v2001_v54 = vpop.f32.mrf.mxu2  ;;  %vm2350_vm14 = vcmp.eq.f32.partialorder %v2349_v14, 8.507059e+37 }
 0x2cd   :  { %v2344_v10 = vadd.f32 %v3739_v13, %v2343_v3  ;;  %v2002_v53 = vadd.f32 %v2001_v54, %v1966_v21 }
 0x2ce   :  { %v2325_v29 = vmul.f32 %v2511_v37, %v2324_v43  ;;  %v3755_v9 = vadd.f32 1e-08, %v2334_v47  ;;  %v3760_v51 = vpop.eup %2514  ;;  %v2352_v43 = vor.u32 1.1754944e-38, %v2351_v0 }
 0x2cf   :  { %v2348_v8 = vsel %vm2347_vm13, %v3739_v13, %v2344_v10  ;;  %vm2361_vm15 = vweird.f32 %v3760_v51 }
 0x2d0   :  { %v2326_v36 = vmul.f32 %v2325_v29, %v3700_v2  ;;  %v3749_v46 = vpop.f32.mrf.mxu0  ;;  %v2101_v16 = vpop.f32.mrf.mxu1  ;;  %2516 = vrcp.f32 %v3755_v9  ;;  %v2353_v11 = vsel %vm2350_vm14, %v2352_v43, %v2348_v8  ;;  %vm2362_vm2 = vmor %vm2360_vm1, %vm2361_vm15  ;;  %v2381_v3 = vand.u32 2147483648, %v3755_v9 }
 0x2d1   :  { %vm2375_vm6 = vweird.f32 %v3755_v9 }
 0x2d2   :  { %v2328_v45 = vsel %vm2327_vm9, %v3700_v2, %v2326_v36  ;;  %v2356_v2 = vmul.f32 %v3760_v51, %v3734_v27  ;;  %v2035_v37 = vpop.f32.mrf.mxu3  ;;  %v2366_v36 = vand.u32 2147483648, %v3734_v27 }
 0x2d3   :  { %v2331_v55 = vsel %vm2329_vm0, %v2330_v40, %v2328_v45  ;;  %v2036_v35 = vadd.f32 %v2035_v37, %v1997_v1  ;;  %v2364_v40 = vand.u32 2147483647, %v3734_v27  ;;  %v1970_v45 = vadd.f32 %v3732_v48, %v3749_v46 }
 0x2d4   :  { %v2335_v62 = vmul.f32 %v2331_v55, %v2283_v61  ;;  %v2357_v49 = vsub.f32 1.0, %v2356_v2  ;;  %v2367_v27 = vor.u32 1.1754944e-38, %v2366_v36 }
 0x2d5   :  { %vm2365_vm3 = vcmp.eq.f32.partialorder %v2364_v40, 8.507059e+37 }
 0x2d6   :  { %v3768_v52 = vadd.f32 1e-08, %v2335_v62  ;;  %v3772_v19 = vpop.eup %2516  ;;  %v2358_v28 = vmul.f32 %v3760_v51, %v2357_v49  ;;  %v2382_v49 = vor.u32 1.1754944e-38, %v2381_v3 }
 0x2d7   :  { %vm2376_vm5 = vweird.f32 %v3772_v19 }
 0x2d8   :  { %v2068_v22 = vpop.f32.mrf.mxu0  ;;  %v2105_v12 = vpop.f32.mrf.mxu1  ;;  %2518 = vrcp.f32 %v3768_v52  ;;  %vm2377_vm7 = vmor %vm2375_vm6, %vm2376_vm5  ;;  %v2396_v54 = vand.u32 2147483648, %v3768_v52  ;;  %vm2390_vm10 = vweird.f32 %v3768_v52 }
 0x2d9   :  { %v2069_v24 = vadd.f32 %v2068_v22, %v2030_v56 }
 0x2da   :  { %v2041_v17 = vpop.f32.mrf.mxu3 }
 0x2db   :  { %v2102_v18 = vadd.f32 %v2101_v16, %v2069_v24  ;;  %v2042_v32 = vadd.f32 %v2041_v17, %v2002_v53  ;;  %v2006_v16 = vpop.f32.mrf.mxu2  ;;  %v2379_v24 = vand.u32 2147483647, %v3755_v9 }
 0x2dc   :  { %v2007_v62 = vadd.f32 %v2006_v16, %v1970_v45 }
 0x2dd   :  { %v2188_v44 = vmul.f32 %v3476_v7, %v2102_v18  ;;  %v2371_v7 = vmul.f32 %v3772_v19, %v3755_v9  ;;  %vm2380_vm8 = vcmp.eq.f32.partialorder %v2379_v24, 8.507059e+37 }
 0x2de   :  { %v3788_v13 = vpop.eup %2518 }
 0x2df   :  { %v2196_v58 = vsub.f32 %v2188_v44, %v3588_v60  ;;  %v2359_v60 = vadd.f32 %v3760_v51, %v2358_v28  ;;  %v2372_v33 = vsub.f32 1.0, %v2371_v7  ;;  %v2386_v30 = vmul.f32 %v3788_v13, %v3768_v52 }
 0x2e0   :  { %v2072_v41 = vpop.f32.mrf.mxu0  ;;  %v2109_v61 = vpop.f32.mrf.mxu1  ;;  %vm2391_vm9 = vweird.f32 %v3788_v13  ;;  %v2397_v7 = vor.u32 1.1754944e-38, %v2396_v54 }
 0x2e1   :  { %v2232_v34 = vsub.f32 0.0, %v2196_v58  ;;  %v2073_v59 = vadd.f32 %v2072_v41, %v2036_v35  ;;  %v2387_v56 = vsub.f32 1.0, %v2386_v30  ;;  %v2394_v58 = vand.u32 2147483647, %v3768_v52  ;;  %vm2392_vm0 = vmor %vm2390_vm10, %vm2391_vm9 }
 0x2e2   :  { %v2047_v1 = vpop.f32.mrf.mxu3 }
 0x2e3   :  { %v2354_v47 = vmul.f32 %v2353_v11, %v2232_v34  ;;  %v2106_v29 = vadd.f32 %v2105_v12, %v2073_v59  ;;  %v2048_v37 = vadd.f32 %v2047_v1, %v2007_v62  ;;  %vm2395_vm11 = vcmp.eq.f32.partialorder %v2394_v58, 8.507059e+37 }
 0x2e5   :  { %v2412_v57 = vmul.f32 %v3237_v26, %v2354_v47  ;;  %v2189_v63 = vmul.f32 %v3509_v50, %v2106_v29  ;;  %v2363_v26 = vsel %vm2362_vm2, %v3760_v51, %v2359_v60  ;;  %v2373_v50 = vmul.f32 %v3772_v19, %v2372_v33 }
 0x2e6   :  { %v2368_v38 = vsel %vm2365_vm3, %v2367_v27, %v2363_v26 }
 0x2e7   :  { %2417 = vst.msk [vmem:[%s3842_s4] sm:$0xff] %vm2416_vm4, %v2412_v57  ;;  %v2197_v4 = vsub.f32 %v2189_v63, %v3598_v6  ;;  %v2374_v51 = vadd.f32 %v3772_v19, %v2373_v50 }
 0x2e8   :  { %v2076_v55 = vpop.f32.mrf.mxu0  ;;  %v2113_v14 = vpop.f32.mrf.mxu1 }
 0x2e9   :  { %v2233_v48 = vsub.f32 0.0, %v2197_v4  ;;  %v2077_v46 = vadd.f32 %v2076_v55, %v2042_v32  ;;  %v2378_v10 = vsel %vm2377_vm7, %v3772_v19, %v2374_v51 }
 0x2ea   :  { %v2383_v9 = vsel %vm2380_vm8, %v2382_v49, %v2378_v10 }
 0x2eb   :  { %v2369_v23 = vmul.f32 %v2368_v38, %v2233_v48  ;;  %v2110_v6 = vadd.f32 %v2109_v61, %v2077_v46 }
 0x2ed   :  { %v2413_v2 = vmul.f32 %v3252_v31, %v2369_v23  ;;  %v2190_v22 = vmul.f32 %v3539_v42, %v2110_v6  ;;  %v2388_v31 = vmul.f32 %v3788_v13, %v2387_v56 }
 0x2ef   :  { %2418 = vst.msk [vmem:[%s3842_s4 + $0x8] sm:$0xff] %vm2416_vm4, %v2413_v2  ;;  %v2198_v18 = vsub.f32 %v2190_v22, %v3607_v5  ;;  %v2389_v12 = vadd.f32 %v3788_v13, %v2388_v31 }
 0x2f0   :  { %v2080_v42 = vpop.f32.mrf.mxu0 }
 0x2f1   :  { %v2234_v0 = vsub.f32 0.0, %v2198_v18  ;;  %v2081_v44 = vadd.f32 %v2080_v42, %v2048_v37  ;;  %v2393_v28 = vsel %vm2392_vm0, %v3788_v13, %v2389_v12 }
 0x2f3   :  { %v2384_v35 = vmul.f32 %v2383_v9, %v2234_v0  ;;  %v2114_v21 = vadd.f32 %v2113_v14, %v2081_v44 }
 0x2f5   :  { %v2414_v5 = vmul.f32 %v3275_v20, %v2384_v35  ;;  %v2191_v19 = vmul.f32 %v3565_v25, %v2114_v21  ;;  %v2398_v20 = vsel %vm2395_vm11, %v2397_v7, %v2393_v28 }
 0x2f7   :  { %2419 = vst.msk [vmem:[%s3842_s4 + $0x10] sm:$0xff] %vm2416_vm4, %v2414_v5  ;;  %v2199_v8 = vsub.f32 %v2191_v19, %v3615_v39 }
 0x2f9   :  { %v2235_v43 = vsub.f32 0.0, %v2199_v8 }
 0x2fb   :  { %v2399_v41 = vmul.f32 %v2398_v20, %v2235_v43 }
 0x2fd   :  { %v2415_v25 = vmul.f32 %v3294_v15, %v2399_v41 }
 0x2ff   :  { %2420 = vst.msk [vmem:[%s3842_s4 + $0x18] sm:$0xff] %vm2416_vm4, %v2415_v25 }
 0x300   :  { %2433 = vsyncpa [#allocation3], 1 }
 0x301   :  { %2434 = vsyncpa [#allocation5], 1 }
 0x302   :  { %2435 = vsyncpa [#allocation8], 1 }

</bundles_post_ra>
